<compile_context>
chip_gen: v7x
topology: tpu7x:2x2x1
jax: 0.10.0
libtpu: 0.0.40
codegen_flags: <defaults>
</compile_context>

<pallas_src>
from collections import deque

import numpy as np
import jax
import jax.numpy as jnp
from jax.experimental import pallas as pl
from jax.experimental.pallas import tpu as pltpu

MAX_NB = 8          # max number of neighbors (JT-VAE convention)
HIDDEN_SIZE = 32
NODE_FEATURE_SIZE = 16
VOCAB_SIZE = 20

HIDDEN_PAD = 128    # pad hidden lanes to a full vreg lane row
FEAT_PAD = 128      # pad node-feature lanes to a full vreg lane row


def _round_up(x, m):
    return ((x + m - 1) // m) * m


# ----------------------------------------------------------------------------
# Pallas kernels
# ----------------------------------------------------------------------------
def tree_gru_kernel(x_ref, hnei_ref, wx_ref, ur_ref, bur_ref, wu_ref, bzh_ref,
                    out_ref):
    """Batched JT-VAE TreeGRU message update.

    x:    (N, F_PAD)
    hnei: (N, MAX_NB, H_PAD)
    wx:   (F_PAD, 3*H_PAD)     packed [Wzx | Wr | Whx] (each block lane-padded)
    ur:   (H_PAD, H_PAD)
    bur:  (1, H_PAD)
    wu:   (2*H_PAD, 2*H_PAD)   block-diagonal [Wzh ; Whh]
    bzh:  (1, 2*H_PAD)         packed [bz | bh]
    out:  (N, H_PAD)
    """
    x = x_ref[...]
    hnei = hnei_ref[...]
    n = x.shape[0]
    hp = hnei.shape[2]

    # One fused x-side matmul for all three gates (lane-dense 3*H_PAD output).
    xw = jnp.dot(x, wx_ref[...], preferred_element_type=jnp.float32)
    zx = xw[:, :hp]
    rx = xw[:, hp:2 * hp]
    hx = xw[:, 2 * hp:]

    # One batched Ur matmul over all MAX_NB neighbors instead of MAX_NB tiny ones.
    ur_out = jnp.dot(hnei.reshape(n * MAX_NB, hp), ur_ref[...],
                     preferred_element_type=jnp.float32).reshape(n, MAX_NB, hp)
    r = jax.nn.sigmoid(ur_out + rx[:, None, :] + bur_ref[...][None, :, :])

    sum_h = jnp.sum(hnei, axis=1)           # (N, H_PAD)
    sum_g = jnp.sum(r * hnei, axis=1)       # (N, H_PAD)

    # Single matmul against the block-diagonal [Wzh ; Whh]:
    #   [sum_h | sum_g] @ blockdiag(Wzh, Whh) = [sum_h@Wzh | sum_g@Whh]
    uw = jnp.dot(jnp.concatenate([sum_h, sum_g], axis=1), wu_ref[...],
                 preferred_element_type=jnp.float32) + bzh_ref[...]
    z = jax.nn.sigmoid(zx + uw[:, :hp])
    pre_h = jnp.tanh(hx + uw[:, hp:])

    out_ref[...] = (1.0 - z) * sum_h + z * pre_h


def node_agg_kernel(x_ref, hnei_ref, wa_ref, ba_ref, out_ref):
    """ReLU(W([x, sum_k h_nei_k])) with a single fused matmul.

    x:    (B, F_PAD)
    hnei: (B, MAX_NB, H_PAD)
    wa:   (F_PAD + H_PAD, H_PAD)   packed [Wax ; Wah]
    ba:   (1, H_PAD)
    out:  (B, H_PAD)
    """
    x = x_ref[...]
    sum_h = jnp.sum(hnei_ref[...], axis=1)
    node_vec = jnp.concatenate([x, sum_h], axis=1)
    y = jnp.dot(node_vec, wa_ref[...], preferred_element_type=jnp.float32) \
        + ba_ref[...]
    out_ref[...] = jnp.maximum(y, 0.0)


# ----------------------------------------------------------------------------
# Pallas wrappers
# ----------------------------------------------------------------------------
def _full_spec(shape):
    nd = len(shape)
    return pl.BlockSpec(shape, lambda i, nd=nd: (0,) * nd)


_COMPILER_PARAMS = pltpu.CompilerParams(dimension_semantics=("arbitrary",))


def tree_gru_pallas(x_emb, h_nei, p):
    n = x_emb.shape[0]
    hp = h_nei.shape[2]
    args = (x_emb, h_nei, p["W_x"], p["Ur"], p["bur"], p["W_u"], p["b_zh"])
    return pl.pallas_call(
        tree_gru_kernel,
        out_shape=jax.ShapeDtypeStruct((n, hp), jnp.float32),
        grid=(1,),
        in_specs=[_full_spec(a.shape) for a in args],
        out_specs=_full_spec((n, hp)),
        compiler_params=_COMPILER_PARAMS,
    )(*args)


def node_agg_pallas(x_emb, h_nei, p):
    n = x_emb.shape[0]
    hp = h_nei.shape[2]
    args = (x_emb, h_nei, p["W_a"], p["ba"])
    return pl.pallas_call(
        node_agg_kernel,
        out_shape=jax.ShapeDtypeStruct((n, hp), jnp.float32),
        grid=(1,),
        in_specs=[_full_spec(a.shape) for a in args],
        out_specs=_full_spec((n, hp)),
        compiler_params=_COMPILER_PARAMS,
    )(*args)


# ----------------------------------------------------------------------------
# Minimal synthetic MolTree stand-ins (host-side glue, matches reference logic)
# ----------------------------------------------------------------------------
class Node:
    def __init__(self, safe_idx, safe_wid):
        self.safe_idx = safe_idx
        self.safe_wid = safe_wid
        self.neighbors = []


class Tree:
    def __init__(self, root, nodes):
        self.root = root
        self.nodes = nodes

    def calc_prop_order(self, up_only=True, id_fn=None):
        # BFS from root; up-only schedule = child->parent edges, deepest first.
        visited = {self.root.safe_idx}
        queue = deque([(self.root, 0)])
        levels_up, levels_down = [], []
        while queue:
            x, d = queue.popleft()
            for y in x.neighbors:
                if y.safe_idx in visited:
                    continue
                visited.add(y.safe_idx)
                queue.append((y, d + 1))
                while len(levels_up) < d + 1:
                    levels_up.append([])
                    levels_down.append([])
                levels_down[d].append((x, y))
                levels_up[d].append((y, x))
        order = levels_up[::-1]
        if not up_only:
            order = order + levels_down
        return order


def make_edge(a, b):
    a.neighbors.append(b)
    b.neighbors.append(a)


def build_synthetic_batch():
    # Tree 0: 5 nodes.  root(0) - {1, 2};  1 - {3, 4}
    n0 = [Node(i, i % VOCAB_SIZE) for i in range(5)]
    make_edge(n0[0], n0[1])
    make_edge(n0[0], n0[2])
    make_edge(n0[1], n0[3])
    make_edge(n0[1], n0[4])
    t0 = Tree(n0[0], n0)
    # Tree 1: 4-node chain. root(5) - 6 - 7 - 8
    n1 = [Node(5 + i, (5 + i) % VOCAB_SIZE) for i in range(4)]
    make_edge(n1[0], n1[1])
    make_edge(n1[1], n1[2])
    make_edge(n1[2], n1[3])
    t1 = Tree(n1[0], n1)
    return [t0, t1]


# ----------------------------------------------------------------------------
# Parameters (deterministic init; PyTorch-Linear-like uniform(+/- 1/sqrt(fan_in)))
# Returns (packed/padded params for the kernels, raw params for the reference).
# ----------------------------------------------------------------------------
def init_params(key, vocab_size, feat, hidden):
    ks = jax.random.split(key, 10)

    def lin(k, fan_in, shape):
        bound = 1.0 / (fan_in ** 0.5)
        return jax.random.uniform(k, shape, jnp.float32, -bound, bound)

    emb = 0.1 * jax.random.normal(ks[0], (vocab_size + 1, feat), jnp.float32)
    emb = emb.at[vocab_size].set(0.0)  # padding_idx row

    wz = lin(ks[1], feat + hidden, (feat + hidden, hidden))
    bz = lin(ks[2], feat + hidden, (1, hidden))
    wr = lin(ks[3], feat, (feat, hidden))                 # W_r: no bias
    ur = lin(ks[4], hidden, (hidden, hidden))
    bur = lin(ks[5], hidden, (1, hidden))
    wh = lin(ks[6], feat + hidden, (feat + hidden, hidden))
    bh = lin(ks[7], feat + hidden, (1, hidden))
    wa = lin(ks[8], feat + hidden, (feat + hidden, hidden))   # self.W
    ba = lin(ks[9], feat + hidden, (1, hidden))

    raw = {
        "embedding": emb,
        "Wzx": wz[:feat], "Wzh": wz[feat:], "bz": bz,
        "Wr": wr, "Ur": ur, "bur": bur,
        "Whx": wh[:feat], "Whh": wh[feat:], "bh": bh,
        "Wax": wa[:feat], "Wah": wa[feat:], "ba": ba,
    }

    fp, hp = FEAT_PAD, HIDDEN_PAD
    emb_p = jnp.zeros((vocab_size + 1, fp), jnp.float32).at[:, :feat].set(emb)

    # Packed x-side weights: [Wzx | Wr | Whx], each gate block lane-padded to hp.
    w_x = jnp.zeros((fp, 3 * hp), jnp.float32)
    w_x = w_x.at[:feat, :hidden].set(wz[:feat])
    w_x = w_x.at[:feat, hp:hp + hidden].set(wr)
    w_x = w_x.at[:feat, 2 * hp:2 * hp + hidden].set(wh[:feat])

    ur_p = jnp.zeros((hp, hp), jnp.float32).at[:hidden, :hidden].set(ur)
    bur_p = jnp.zeros((1, hp), jnp.float32).at[:, :hidden].set(bur)

    # Block-diagonal [Wzh ; Whh] so [sum_h | sum_g] needs a single matmul.
    w_u = jnp.zeros((2 * hp, 2 * hp), jnp.float32)
    w_u = w_u.at[:hidden, :hidden].set(wz[feat:])
    w_u = w_u.at[hp:hp + hidden, hp:hp + hidden].set(wh[feat:])
    b_zh = jnp.zeros((1, 2 * hp), jnp.float32)
    b_zh = b_zh.at[:, :hidden].set(bz).at[:, hp:hp + hidden].set(bh)

    # Node aggregation: [Wax ; Wah] for the fused [x | sum_h] matmul.
    w_a = jnp.zeros((fp + hp, hp), jnp.float32)
    w_a = w_a.at[:feat, :hidden].set(wa[:feat])
    w_a = w_a.at[fp:fp + hidden, :hidden].set(wa[feat:])
    ba_p = jnp.zeros((1, hp), jnp.float32).at[:, :hidden].set(ba)

    packed = {"emb": emb_p, "W_x": w_x, "Ur": ur_p, "bur": bur_p,
              "W_u": w_u, "b_zh": b_zh, "W_a": w_a, "ba": ba_p}
    return packed, raw


# ----------------------------------------------------------------------------
# Host-side schedule: flatten the tree traversal into static int32 index tables
# (this replaces the per-level Python dict / per-edge stacking of the reference).
# ----------------------------------------------------------------------------
def build_schedule(mol_batch):
    orders = [mt.calc_prop_order(up_only=True) for mt in mol_batch]
    max_depth = max((len(o) for o in orders), default=0)

    levels = []
    edge_slot = {}                       # (src_idx, dst_idx) -> msg buffer row
    for t in range(max_depth):
        plist = []
        for order in orders:
            if t < len(order):
                plist.extend(order[t])
        levels.append(plist)
        for nx, ny in plist:
            edge_slot[(nx.safe_idx, ny.safe_idx)] = 1 + len(edge_slot)

    n_edges = len(edge_slot)
    zero_slot = 0                        # permanently-zero padding message
    dump_slot = n_edges + 1              # writeback target for padding edges
    e_buf = _round_up(n_edges + 2, 8)
    e_lvl = max(8, _round_up(max((len(p) for p in levels), default=0), 8))

    lvl_wid = np.full((max_depth, e_lvl), VOCAB_SIZE, np.int32)   # padding_idx
    lvl_nei = np.full((max_depth, e_lvl, MAX_NB), zero_slot, np.int32)
    lvl_out = np.full((max_depth, e_lvl), dump_slot, np.int32)
    for t, plist in enumerate(levels):
        for i, (nx, ny) in enumerate(plist):
            lvl_wid[t, i] = nx.safe_wid
            lvl_out[t, i] = edge_slot[(nx.safe_idx, ny.safe_idx)]
            k = 0
            for nz in nx.neighbors:
                if nz.safe_idx == ny.safe_idx:
                    continue
                if k >= MAX_NB:
                    break
                lvl_nei[t, i, k] = edge_slot[(nz.safe_idx, nx.safe_idx)]
                k += 1

    roots = [mt.root for mt in mol_batch]
    n_roots = len(roots)
    b_pad = max(8, _round_up(n_roots, 8))
    root_wid = np.full((b_pad,), VOCAB_SIZE, np.int32)
    root_nei = np.full((b_pad, MAX_NB), zero_slot, np.int32)
    for i, nx in enumerate(roots):
        if nx is None:
            continue   # None root -> padding embedding + zero neighbors
        root_wid[i] = nx.safe_wid
        for k, ny in enumerate(nx.neighbors[:MAX_NB]):
            root_nei[i, k] = edge_slot[(ny.safe_idx, nx.safe_idx)]

    return dict(edge_slot=edge_slot, e_buf=e_buf, n_roots=n_roots,
                lvl_wid=lvl_wid, lvl_nei=lvl_nei, lvl_out=lvl_out,
                root_wid=root_wid, root_nei=root_nei)


# ----------------------------------------------------------------------------
# One jitted program: lax.scan over levels + root aggregation.
# ----------------------------------------------------------------------------
# TODO(synk): the level loop could be collapsed further into a single
# pallas_call with grid=(max_depth,) + scalar-prefetched schedule tables and an
# in-VMEM message buffer; the scan version already removes recompiles and
# per-level Python dispatch, which dominated the previous version's runtime.
@jax.jit
def _run_encoder(msg0, lvl_wid, lvl_nei, lvl_out, root_wid, root_nei, params):
    emb = params["emb"]

    def step(msg, lvl):
        wid, nei, out = lvl
        x_emb = emb[wid]                       # (E, F_PAD) gather
        h_nei = msg[nei]                       # (E, MAX_NB, H_PAD) gather
        new_h = tree_gru_pallas(x_emb, h_nei, params)
        return msg.at[out].set(new_h), None    # scatter writeback

    msg, _ = jax.lax.scan(step, msg0, (lvl_wid, lvl_nei, lvl_out))

    root_x = emb[root_wid]
    root_h_nei = msg[root_nei]
    root_vecs = node_agg_pallas(root_x, root_h_nei, params)
    return msg, root_vecs


# ----------------------------------------------------------------------------
# TreeEncoder.forward equivalent
# ----------------------------------------------------------------------------
def tree_encoder_forward(mol_batch, params):
    sched = build_schedule(mol_batch)
    msg0 = jnp.zeros((sched["e_buf"], HIDDEN_PAD), jnp.float32)
    msg, root_pad = _run_encoder(
        msg0,
        jnp.asarray(sched["lvl_wid"]), jnp.asarray(sched["lvl_nei"]),
        jnp.asarray(sched["lvl_out"]),
        jnp.asarray(sched["root_wid"]), jnp.asarray(sched["root_nei"]),
        params)

    root_vecs = root_pad[:sched["n_roots"], :HIDDEN_SIZE]
    msg_valid = msg[:, :HIDDEN_SIZE]
    # Reconstruct the MsgDict view once, outside the hot path.
    h = {key: msg_valid[slot] for key, slot in sched["edge_slot"].items()}
    return h, root_vecs


# ----------------------------------------------------------------------------
# Pure-JAX reference (mirrors the PyTorch module, dict-based) for verification.
# ----------------------------------------------------------------------------
def reference_forward(mol_batch, rp):
    orders = [mt.calc_prop_order(up_only=True) for mt in mol_batch]
    h = {}
    max_depth = max((len(o) for o in orders), default=0)
    pad = jnp.zeros((HIDDEN_SIZE,), jnp.float32)
    emb = rp["embedding"]

    for t in range(max_depth):
        prop_list = []
        for order in orders:
            if t < len(order):
                prop_list.extend(order[t])
        if not prop_list:
            continue
        xw, hn = [], []
        for nx, ny in prop_list:
            xw.append(nx.safe_wid)
            nei = [h[(nz.safe_idx, nx.safe_idx)] for nz in nx.neighbors
                   if nz.safe_idx != ny.safe_idx]
            nei = nei + [pad] * (MAX_NB - len(nei))
            hn.append(jnp.stack(nei, axis=0))
        x = emb[jnp.asarray(xw, jnp.int32)]
        hnei = jnp.stack(hn, axis=0)
        n = x.shape[0]
        sum_h = hnei.sum(axis=1)
        ur_out = (hnei.reshape(-1, HIDDEN_SIZE) @ rp["Ur"]).reshape(
            n, MAX_NB, HIDDEN_SIZE)
        r = jax.nn.sigmoid(ur_out + (x @ rp["Wr"])[:, None, :] + rp["bur"])
        sum_g = (r * hnei).sum(axis=1)
        z = jax.nn.sigmoid(x @ rp["Wzx"] + sum_h @ rp["Wzh"] + rp["bz"])
        pre_h = jnp.tanh(x @ rp["Whx"] + sum_g @ rp["Whh"] + rp["bh"])
        new_h = (1.0 - z) * sum_h + z * pre_h
        for i, (nx, ny) in enumerate(prop_list):
            h[(nx.safe_idx, ny.safe_idx)] = new_h[i]

    roots = [mt.root for mt in mol_batch]
    xw, hn = [], []
    for nx in roots:
        if nx is None:
            xw.append(VOCAB_SIZE)
            nei = []
        else:
            xw.append(nx.safe_wid)
            nei = [h[(ny.safe_idx, nx.safe_idx)] for ny in nx.neighbors][:MAX_NB]
        nei = nei + [pad] * (MAX_NB - len(nei))
        hn.append(jnp.stack(nei, axis=0))
    x = emb[jnp.asarray(xw, jnp.int32)]
    sum_h = jnp.stack(hn, axis=0).sum(axis=1)
    root = jax.nn.relu(x @ rp["Wax"] + sum_h @ rp["Wah"] + rp["ba"])
    return h, root


# ----------------------------------------------------------------------------
if __name__ == "__main__":
    key = jax.random.PRNGKey(0)
    params, raw_params = init_params(key, VOCAB_SIZE, NODE_FEATURE_SIZE,
                                     HIDDEN_SIZE)
    mol_batch = build_synthetic_batch()

    h_msgs, root_vecs = tree_encoder_forward(mol_batch, params)
    root_vecs = jax.block_until_ready(root_vecs)

    assert root_vecs.shape == (len(mol_batch), HIDDEN_SIZE)
    assert bool(jnp.all(jnp.isfinite(root_vecs)))

    # Verify against the dict-based pure-JAX reference of the same module.
    h_ref, root_ref = reference_forward(mol_batch, raw_params)
    assert np.allclose(np.asarray(root_vecs), np.asarray(root_ref),
                       rtol=1e-4, atol=1e-5)
    for edge_key, v_ref in h_ref.items():
        assert np.allclose(np.asarray(h_msgs[edge_key]), np.asarray(v_ref),
                           rtol=1e-4, atol=1e-5)

    # TODO(synk): TreeGRU source is not included in the reference module; the
    # standard JT-VAE tree GRU equations are assumed (W_r has no bias, z uses
    # sum_h), identical to the previous version.
    print("KERNEL_OK")
</pallas_src>

<mosaic_0001>
module attributes {stable_mosaic.version = 11 : i64} {
  func.func @tree_gru_kernel(%arg0: i32, %arg1: memref<8x128xf32, #tpu.memory_space<vmem>>, %arg2: memref<8x8x128xf32, #tpu.memory_space<vmem>>, %arg3: memref<128x384xf32, #tpu.memory_space<vmem>>, %arg4: memref<128x128xf32, #tpu.memory_space<vmem>>, %arg5: memref<1x128xf32, #tpu.memory_space<vmem>>, %arg6: memref<256x256xf32, #tpu.memory_space<vmem>>, %arg7: memref<1x256xf32, #tpu.memory_space<vmem>>, %arg8: memref<8x128xf32, #tpu.memory_space<vmem>>) attributes {dimension_semantics = [#tpu.dimension_semantics<arbitrary>], iteration_bounds = array<i64: 1>, scalar_prefetch = 0 : i64, scratch_operands = 0 : i64, tpu.core_type = #tpu.core_type<tc>, window_params = [{pipeline_mode = #tpu.pipeline_mode<synchronous>, transform_indices = @transform_0, window_bounds = array<i64: 8, 128>}, {pipeline_mode = #tpu.pipeline_mode<synchronous>, transform_indices = @transform_1, window_bounds = array<i64: 8, 8, 128>}, {pipeline_mode = #tpu.pipeline_mode<synchronous>, transform_indices = @transform_2, window_bounds = array<i64: 128, 384>}, {pipeline_mode = #tpu.pipeline_mode<synchronous>, transform_indices = @transform_3, window_bounds = array<i64: 128, 128>}, {pipeline_mode = #tpu.pipeline_mode<synchronous>, transform_indices = @transform_4, window_bounds = array<i64: 1, 128>}, {pipeline_mode = #tpu.pipeline_mode<synchronous>, transform_indices = @transform_5, window_bounds = array<i64: 256, 256>}, {pipeline_mode = #tpu.pipeline_mode<synchronous>, transform_indices = @transform_6, window_bounds = array<i64: 1, 256>}, {pipeline_mode = #tpu.pipeline_mode<synchronous>, transform_indices = @transform_7, window_bounds = array<i64: 8, 128>}]} {
    %c0 = arith.constant 0 : index
    %c0_0 = arith.constant 0 : index
    %0 = vector.load %arg1[%c0, %c0_0] : memref<8x128xf32, #tpu.memory_space<vmem>>, vector<8x128xf32>
    %c0_1 = arith.constant 0 : index
    %c0_2 = arith.constant 0 : index
    %c0_3 = arith.constant 0 : index
    %1 = vector.load %arg2[%c0_1, %c0_2, %c0_3] : memref<8x8x128xf32, #tpu.memory_space<vmem>>, vector<8x8x128xf32>
    %c0_4 = arith.constant 0 : index
    %c0_5 = arith.constant 0 : index
    %2 = vector.load %arg3[%c0_4, %c0_5] : memref<128x384xf32, #tpu.memory_space<vmem>>, vector<128x384xf32>
    %cst = arith.constant dense<0.000000e+00> : vector<8x384xf32>
    %3 = tpu.matmul %0, %2, %cst {dimension_numbers = #tpu.dot_dimension_numbers<[1], [0], [0], [1], [0, 0, 1, 1], [], []>} : vector<8x128xf32>, vector<128x384xf32>, vector<8x384xf32> -> vector<8x384xf32>
    %4 = vector.extract_strided_slice %3 {offsets = [0, 0], sizes = [8, 128], strides = [1, 1]} : vector<8x384xf32> to vector<8x128xf32>
    %5 = vector.extract_strided_slice %3 {offsets = [0, 128], sizes = [8, 128], strides = [1, 1]} : vector<8x384xf32> to vector<8x128xf32>
    %6 = vector.extract_strided_slice %3 {offsets = [0, 256], sizes = [8, 128], strides = [1, 1]} : vector<8x384xf32> to vector<8x128xf32>
    %7 = vector.shape_cast %1 : vector<8x8x128xf32> to vector<64x128xf32>
    %c0_6 = arith.constant 0 : index
    %c0_7 = arith.constant 0 : index
    %8 = vector.load %arg4[%c0_6, %c0_7] : memref<128x128xf32, #tpu.memory_space<vmem>>, vector<128x128xf32>
    %cst_8 = arith.constant dense<0.000000e+00> : vector<64x128xf32>
    %9 = tpu.matmul %7, %8, %cst_8 {dimension_numbers = #tpu.dot_dimension_numbers<[1], [0], [0], [1], [0, 0, 1, 1], [], []>} : vector<64x128xf32>, vector<128x128xf32>, vector<64x128xf32> -> vector<64x128xf32>
    %10 = vector.shape_cast %9 : vector<64x128xf32> to vector<8x8x128xf32>
    %11 = vector.shape_cast %5 : vector<8x128xf32> to vector<8x1x128xf32>
    %12 = vector.broadcast %11 : vector<8x1x128xf32> to vector<8x8x128xf32>
    %13 = arith.addf %10, %12 : vector<8x8x128xf32>
    %c0_9 = arith.constant 0 : index
    %c0_10 = arith.constant 0 : index
    %14 = vector.load %arg5[%c0_9, %c0_10] : memref<1x128xf32, #tpu.memory_space<vmem>>, vector<1x128xf32>
    %15 = vector.shape_cast %14 : vector<1x128xf32> to vector<1x1x128xf32>
    %16 = vector.broadcast %15 : vector<1x1x128xf32> to vector<8x8x128xf32>
    %17 = arith.addf %13, %16 : vector<8x8x128xf32>
    %18 = arith.negf %17 : vector<8x8x128xf32>
    %19 = math.exp %18 : vector<8x8x128xf32>
    %cst_11 = arith.constant 1.000000e+00 : f32
    %20 = vector.broadcast %cst_11 : f32 to vector<8x8x128xf32>
    %21 = arith.addf %20, %19 : vector<8x8x128xf32>
    %22 = arith.divf %20, %21 : vector<8x8x128xf32>
    %cst_12 = arith.constant dense<0.000000e+00> : vector<8x128xf32>
    %23 = vector.multi_reduction <add>, %1, %cst_12 [1] : vector<8x8x128xf32> to vector<8x128xf32>
    %24 = arith.mulf %22, %1 : vector<8x8x128xf32>
    %cst_13 = arith.constant dense<0.000000e+00> : vector<8x128xf32>
    %25 = vector.multi_reduction <add>, %24, %cst_13 [1] : vector<8x8x128xf32> to vector<8x128xf32>
    %26 = tpu.concatenate %23, %25 in 1 : vector<8x128xf32>, vector<8x128xf32> -> vector<8x256xf32>
    %c0_14 = arith.constant 0 : index
    %c0_15 = arith.constant 0 : index
    %27 = vector.load %arg6[%c0_14, %c0_15] : memref<256x256xf32, #tpu.memory_space<vmem>>, vector<256x256xf32>
    %cst_16 = arith.constant dense<0.000000e+00> : vector<8x256xf32>
    %28 = tpu.matmul %26, %27, %cst_16 {dimension_numbers = #tpu.dot_dimension_numbers<[1], [0], [0], [1], [0, 0, 1, 1], [], []>} : vector<8x256xf32>, vector<256x256xf32>, vector<8x256xf32> -> vector<8x256xf32>
    %c0_17 = arith.constant 0 : index
    %c0_18 = arith.constant 0 : index
    %29 = vector.load %arg7[%c0_17, %c0_18] : memref<1x256xf32, #tpu.memory_space<vmem>>, vector<1x256xf32>
    %30 = vector.broadcast %29 : vector<1x256xf32> to vector<8x256xf32>
    %31 = arith.addf %28, %30 : vector<8x256xf32>
    %32 = vector.extract_strided_slice %31 {offsets = [0, 0], sizes = [8, 128], strides = [1, 1]} : vector<8x256xf32> to vector<8x128xf32>
    %33 = arith.addf %4, %32 : vector<8x128xf32>
    %34 = arith.negf %33 : vector<8x128xf32>
    %35 = math.exp %34 : vector<8x128xf32>
    %cst_19 = arith.constant 1.000000e+00 : f32
    %36 = vector.broadcast %cst_19 : f32 to vector<8x128xf32>
    %37 = arith.addf %36, %35 : vector<8x128xf32>
    %38 = arith.divf %36, %37 : vector<8x128xf32>
    %39 = vector.extract_strided_slice %31 {offsets = [0, 128], sizes = [8, 128], strides = [1, 1]} : vector<8x256xf32> to vector<8x128xf32>
    %40 = arith.addf %6, %39 : vector<8x128xf32>
    %41 = math.tanh %40 : vector<8x128xf32>
    %cst_20 = arith.constant 1.000000e+00 : f32
    %42 = vector.broadcast %cst_20 : f32 to vector<8x128xf32>
    %43 = arith.subf %42, %38 : vector<8x128xf32>
    %44 = arith.mulf %43, %23 : vector<8x128xf32>
    %45 = arith.mulf %38, %41 : vector<8x128xf32>
    %46 = arith.addf %44, %45 : vector<8x128xf32>
    %c0_21 = arith.constant 0 : index
    %c0_22 = arith.constant 0 : index
    %47 = vector.load %arg8[%c0_21, %c0_22] : memref<8x128xf32, #tpu.memory_space<vmem>>, vector<8x128xf32>
    tpu.vector_store %arg8[%c0_21, %c0_22], %46 {strides = array<i32>} : memref<8x128xf32, #tpu.memory_space<vmem>>, vector<8x128xf32>,
    return
  }
  func.func @transform_0(%arg0: i32) -> (i32, i32) {
    %c0_i32 = arith.constant 0 : i32
    %c0_i32_0 = arith.constant 0 : i32
    %c0_i32_1 = arith.constant 0 : i32
    return %c0_i32, %c0_i32_0 : i32, i32
  }
  func.func @transform_1(%arg0: i32) -> (i32, i32, i32) {
    %c0_i32 = arith.constant 0 : i32
    %c0_i32_0 = arith.constant 0 : i32
    %c0_i32_1 = arith.constant 0 : i32
    %c0_i32_2 = arith.constant 0 : i32
    return %c0_i32, %c0_i32_0, %c0_i32_1 : i32, i32, i32
  }
  func.func @transform_2(%arg0: i32) -> (i32, i32) {
    %c0_i32 = arith.constant 0 : i32
    %c0_i32_0 = arith.constant 0 : i32
    %c0_i32_1 = arith.constant 0 : i32
    return %c0_i32, %c0_i32_0 : i32, i32
  }
  func.func @transform_3(%arg0: i32) -> (i32, i32) {
    %c0_i32 = arith.constant 0 : i32
    %c0_i32_0 = arith.constant 0 : i32
    %c0_i32_1 = arith.constant 0 : i32
    return %c0_i32, %c0_i32_0 : i32, i32
  }
  func.func @transform_4(%arg0: i32) -> (i32, i32) {
    %c0_i32 = arith.constant 0 : i32
    %c0_i32_0 = arith.constant 0 : i32
    %c0_i32_1 = arith.constant 0 : i32
    return %c0_i32, %c0_i32_0 : i32, i32
  }
  func.func @transform_5(%arg0: i32) -> (i32, i32) {
    %c0_i32 = arith.constant 0 : i32
    %c0_i32_0 = arith.constant 0 : i32
    %c0_i32_1 = arith.constant 0 : i32
    return %c0_i32, %c0_i32_0 : i32, i32
  }
  func.func @transform_6(%arg0: i32) -> (i32, i32) {
    %c0_i32 = arith.constant 0 : i32
    %c0_i32_0 = arith.constant 0 : i32
    %c0_i32_1 = arith.constant 0 : i32
    return %c0_i32, %c0_i32_0 : i32, i32
  }
  func.func @transform_7(%arg0: i32) -> (i32, i32) {
    %c0_i32 = arith.constant 0 : i32
    %c0_i32_0 = arith.constant 0 : i32
    %c0_i32_1 = arith.constant 0 : i32
    return %c0_i32, %c0_i32_0 : i32, i32
  }
}

module attributes {stable_mosaic.version = 11 : i64} {
  func.func @node_agg_kernel(%arg0: i32, %arg1: memref<8x128xf32, #tpu.memory_space<vmem>>, %arg2: memref<8x8x128xf32, #tpu.memory_space<vmem>>, %arg3: memref<256x128xf32, #tpu.memory_space<vmem>>, %arg4: memref<1x128xf32, #tpu.memory_space<vmem>>, %arg5: memref<8x128xf32, #tpu.memory_space<vmem>>) attributes {dimension_semantics = [#tpu.dimension_semantics<arbitrary>], iteration_bounds = array<i64: 1>, scalar_prefetch = 0 : i64, scratch_operands = 0 : i64, tpu.core_type = #tpu.core_type<tc>, window_params = [{pipeline_mode = #tpu.pipeline_mode<synchronous>, transform_indices = @transform_0, window_bounds = array<i64: 8, 128>}, {pipeline_mode = #tpu.pipeline_mode<synchronous>, transform_indices = @transform_1, window_bounds = array<i64: 8, 8, 128>}, {pipeline_mode = #tpu.pipeline_mode<synchronous>, transform_indices = @transform_2, window_bounds = array<i64: 256, 128>}, {pipeline_mode = #tpu.pipeline_mode<synchronous>, transform_indices = @transform_3, window_bounds = array<i64: 1, 128>}, {pipeline_mode = #tpu.pipeline_mode<synchronous>, transform_indices = @transform_4, window_bounds = array<i64: 8, 128>}]} {
    %c0 = arith.constant 0 : index
    %c0_0 = arith.constant 0 : index
    %0 = vector.load %arg1[%c0, %c0_0] : memref<8x128xf32, #tpu.memory_space<vmem>>, vector<8x128xf32>
    %c0_1 = arith.constant 0 : index
    %c0_2 = arith.constant 0 : index
    %c0_3 = arith.constant 0 : index
    %1 = vector.load %arg2[%c0_1, %c0_2, %c0_3] : memref<8x8x128xf32, #tpu.memory_space<vmem>>, vector<8x8x128xf32>
    %cst = arith.constant dense<0.000000e+00> : vector<8x128xf32>
    %2 = vector.multi_reduction <add>, %1, %cst [1] : vector<8x8x128xf32> to vector<8x128xf32>
    %3 = tpu.concatenate %0, %2 in 1 : vector<8x128xf32>, vector<8x128xf32> -> vector<8x256xf32>
    %c0_4 = arith.constant 0 : index
    %c0_5 = arith.constant 0 : index
    %4 = vector.load %arg3[%c0_4, %c0_5] : memref<256x128xf32, #tpu.memory_space<vmem>>, vector<256x128xf32>
    %cst_6 = arith.constant dense<0.000000e+00> : vector<8x128xf32>
    %5 = tpu.matmul %3, %4, %cst_6 {dimension_numbers = #tpu.dot_dimension_numbers<[1], [0], [0], [1], [0, 0, 1, 1], [], []>} : vector<8x256xf32>, vector<256x128xf32>, vector<8x128xf32> -> vector<8x128xf32>
    %c0_7 = arith.constant 0 : index
    %c0_8 = arith.constant 0 : index
    %6 = vector.load %arg4[%c0_7, %c0_8] : memref<1x128xf32, #tpu.memory_space<vmem>>, vector<1x128xf32>
    %7 = vector.broadcast %6 : vector<1x128xf32> to vector<8x128xf32>
    %8 = arith.addf %5, %7 : vector<8x128xf32>
    %cst_9 = arith.constant 0.000000e+00 : f32
    %9 = vector.broadcast %cst_9 : f32 to vector<8x128xf32>
    %10 = arith.maximumf %8, %9 : vector<8x128xf32>
    %c0_10 = arith.constant 0 : index
    %c0_11 = arith.constant 0 : index
    %11 = vector.load %arg5[%c0_10, %c0_11] : memref<8x128xf32, #tpu.memory_space<vmem>>, vector<8x128xf32>
    tpu.vector_store %arg5[%c0_10, %c0_11], %10 {strides = array<i32>} : memref<8x128xf32, #tpu.memory_space<vmem>>, vector<8x128xf32>,
    return
  }
  func.func @transform_0(%arg0: i32) -> (i32, i32) {
    %c0_i32 = arith.constant 0 : i32
    %c0_i32_0 = arith.constant 0 : i32
    %c0_i32_1 = arith.constant 0 : i32
    return %c0_i32, %c0_i32_0 : i32, i32
  }
  func.func @transform_1(%arg0: i32) -> (i32, i32, i32) {
    %c0_i32 = arith.constant 0 : i32
    %c0_i32_0 = arith.constant 0 : i32
    %c0_i32_1 = arith.constant 0 : i32
    %c0_i32_2 = arith.constant 0 : i32
    return %c0_i32, %c0_i32_0, %c0_i32_1 : i32, i32, i32
  }
  func.func @transform_2(%arg0: i32) -> (i32, i32) {
    %c0_i32 = arith.constant 0 : i32
    %c0_i32_0 = arith.constant 0 : i32
    %c0_i32_1 = arith.constant 0 : i32
    return %c0_i32, %c0_i32_0 : i32, i32
  }
  func.func @transform_3(%arg0: i32) -> (i32, i32) {
    %c0_i32 = arith.constant 0 : i32
    %c0_i32_0 = arith.constant 0 : i32
    %c0_i32_1 = arith.constant 0 : i32
    return %c0_i32, %c0_i32_0 : i32, i32
  }
  func.func @transform_4(%arg0: i32) -> (i32, i32) {
    %c0_i32 = arith.constant 0 : i32
    %c0_i32_0 = arith.constant 0 : i32
    %c0_i32_1 = arith.constant 0 : i32
    return %c0_i32, %c0_i32_0 : i32, i32
  }
}

</mosaic_0001>

<bundles_post_ra>
// kernel: _run_encoder.1
= control target key start
LH: loop header
LB: loop body
LE: loop exit
PB: predicated region body
PF: predicated region fallthrough
CT: control target
= control target key end

     0   :  { %vm83_vm0 = vcmask 1041409   ;;  %vm85_vm1 = vcmask 1042434   ;;  %s512_s0 = inlined_call_operand.vmem [shape: f32[8,128], index: 0, kind: input, shape index: {}]   ;;  %s513_s1 = inlined_call_operand.vmem [shape: f32[8,8,128], index: 1, kind: input, shape index: {}]   ;;  %s514_s2 = inlined_call_operand.vmem [shape: f32[256,128], index: 2, kind: input, shape index: {}]   ;;  %s515_s3 = inlined_call_operand.vmem [shape: f32[1,128], index: 3, kind: input, shape index: {}]   ;;  %s516_s4 = inlined_call_operand.hbm [shape: f32[8,128], index: 4, kind: output, shape index: {}]  }
   0x1   :  { %v114_v0 = vld [vmem:[%s514_s2 + $0x80] sm:$0xff]  ;;  %v115_v1 = vld [vmem:[%s514_s2 + $0x88] sm:$0xff]  ;;  %v116_v5 = vld [vmem:[%s514_s2 + $0x90] sm:$0xff] }
   0x2   :  { %v98_v2 = vld [vmem:[%s514_s2] sm:$0xff]  ;;  %v259_v3 = vpack.c.bf16 %v115_v1, %v114_v0  ;;  %v99_v4 = vld [vmem:[%s514_s2 + $0x8] sm:$0xff]  ;;  %v117_v6 = vld [vmem:[%s514_s2 + $0x98] sm:$0xff] }
   0x3   :  { %v261_v7 = vpack.c.bf16 %v99_v4, %v98_v2  ;;  %v263_v8 = vpack.c.bf16 %v117_v6, %v116_v5  ;;  %v100_v9 = vld [vmem:[%s514_s2 + $0x10] sm:$0xff]  ;;  %v101_v10 = vld [vmem:[%s514_s2 + $0x18] sm:$0xff]  ;;  %v118_v11 = vld [vmem:[%s514_s2 + $0xa0] sm:$0xff] }
   0x4   :  { %260 = vmatprep.subr.bf16.mxu0 %v259_v3  ;;  %v119_v12 = vld [vmem:[%s514_s2 + $0xa8] sm:$0xff]  ;;  %v265_v13 = vpack.c.bf16 %v101_v10, %v100_v9  ;;  %v102_v14 = vld [vmem:[%s514_s2 + $0x20] sm:$0xff]  ;;  %v120_v17 = vld [vmem:[%s514_s2 + $0xb0] sm:$0xff] }
   0x5   :  { %262 = vmatpush3.bf16.msra.mxu0 %v261_v7  ;;  %v103_v15 = vld [vmem:[%s514_s2 + $0x28] sm:$0xff]  ;;  %v267_v16 = vpack.c.bf16 %v119_v12, %v118_v11  ;;  %v121_v18 = vld [vmem:[%s514_s2 + $0xb8] sm:$0xff]  ;;  %v104_v19 = vld [vmem:[%s514_s2 + $0x30] sm:$0xff] }
   0x6   :  { %264 = vmatprep.subr.bf16.mxu0 %v263_v8  ;;  %v105_v20 = vld [vmem:[%s514_s2 + $0x38] sm:$0xff]  ;;  %v122_v21 = vld [vmem:[%s514_s2 + $0xc0] sm:$0xff]  ;;  %v123_v22 = vld [vmem:[%s514_s2 + $0xc8] sm:$0xff]  ;;  %v269_v26 = vpack.c.bf16 %v103_v15, %v102_v14  ;;  %v271_v30 = vpack.c.bf16 %v121_v18, %v120_v17 }
   0x7   :  { %v399_v23 = vld [vmem:[%s514_s2 + $0x40] sm:$0xff]  ;;  %v404_v24 = vld [vmem:[%s514_s2 + $0x48] sm:$0xff]  ;;  %v409_v25 = vld [vmem:[%s514_s2 + $0xd0] sm:$0xff]  ;;  %v273_v33 = vpack.c.bf16 %v105_v20, %v104_v19  ;;  %v275_v34 = vpack.c.bf16 %v123_v22, %v122_v21 }
   0x8   :  { %v414_v27 = vld [vmem:[%s514_s2 + $0xd8] sm:$0xff]  ;;  %v419_v28 = vld [vmem:[%s514_s2 + $0x50] sm:$0xff]  ;;  %v429_v31 = vld [vmem:[%s514_s2 + $0xe0] sm:$0xff]  ;;  %v277_v36 = vpack.c.bf16 %v404_v24, %v399_v23 }
   0x9   :  { %266 = vmatpush3.bf16.msra.mxu0 %v265_v13  ;;  %v424_v29 = vld [vmem:[%s514_s2 + $0x58] sm:$0xff]  ;;  %v434_v32 = vld [vmem:[%s514_s2 + $0xe8] sm:$0xff]  ;;  %v19_v35 = vld [vmem:[%s513_s1] sm:$0xff]  ;;  %v279_v37 = vpack.c.bf16 %v414_v27, %v409_v25 }
   0xa   :  { %268 = vmatprep.subr.bf16.mxu0 %v267_v16  ;;  %v281_v38 = vpack.c.bf16 %v424_v29, %v419_v28  ;;  %v20_v39 = vld [vmem:[%s513_s1 + $0x8] sm:$0xff]  ;;  %v21_v40 = vld [vmem:[%s513_s1 + $0x10] sm:$0xff]  ;;  %v22_v41 = vld [vmem:[%s513_s1 + $0x18] sm:$0xff]  ;;  %v27_v42 = vrot.slane %v19_v35, 4  ;;  %v283_v43 = vpack.c.bf16 %v434_v32, %v429_v31 }
   0xb   :  { %v23_v44 = vld [vmem:[%s513_s1 + $0x20] sm:$0xff]  ;;  %v24_v45 = vld [vmem:[%s513_s1 + $0x28] sm:$0xff]  ;;  %v25_v46 = vld [vmem:[%s513_s1 + $0x30] sm:$0xff]  ;;  %v33_v47 = vrot.slane %v20_v39, 4  ;;  %v39_v48 = vrot.slane %v21_v40, 4  ;;  %v45_v49 = vrot.slane %v22_v41, 4 }
   0xc   :  { %v26_v50 = vld [vmem:[%s513_s1 + $0x38] sm:$0xff]  ;;  %v28_v51 = vadd.f32 %v27_v42, %v19_v35  ;;  %v51_v52 = vrot.slane %v23_v44, 4  ;;  %v57_v53 = vrot.slane %v24_v45, 4  ;;  %v63_v54 = vrot.slane %v25_v46, 4 }
   0xd   :  { %270 = vmatpush3.bf16.msra.mxu0 %v269_v26  ;;  %v34_v55 = vadd.f32 %v33_v47, %v20_v39  ;;  %v40_v56 = vadd.f32 %v39_v48, %v21_v40  ;;  %v46_v57 = vadd.f32 %v45_v49, %v22_v41  ;;  %v69_v58 = vrot.slane %v26_v50, 4 }
   0xe   :  { %272 = vmatprep.subr.bf16.mxu0 %v271_v30 }
   0xf   :  { %9 = vsyncpa [#allocation3], 0  ;;  %v29_v59 = vrot.slane %v28_v51, 2  ;;  %v52_v60 = vadd.f32 %v51_v52, %v23_v44  ;;  %v58_v61 = vadd.f32 %v57_v53, %v24_v45  ;;  %v64_v62 = vadd.f32 %v63_v54, %v25_v46  ;;  %v110_v19 = vld [vmem:[%s514_s2 + $0x60] sm:$0xff]  ;;  %v111_v20 = vld [vmem:[%s514_s2 + $0x68] sm:$0xff]  ;;  %s316_s19 = smov [#allocation2]  }
  0x10   :  { %v35_v63 = vrot.slane %v34_v55, 2  ;;  %v41_v0 = vrot.slane %v40_v56, 2  ;;  %v47_v1 = vrot.slane %v46_v57, 2  ;;  %v70_v2 = vadd.f32 %v69_v58, %v26_v50  ;;  %v128_v25 = vld [vmem:[%s514_s2 + $0xf0] sm:$0xff]  ;;  %v129_v26 = vld [vmem:[%s514_s2 + $0xf8] sm:$0xff]  ;;  %v18_v47 = vld [vmem:[%s512_s0] sm:$0xff] }
  0x11   :  { %274 = vmatpush3.bf16.msra.mxu0 %v273_v33  ;;  %v30_v3 = vadd.f32 %v29_v59, %v28_v51  ;;  %v53_v4 = vrot.slane %v52_v60, 2  ;;  %v59_v5 = vrot.slane %v58_v61, 2  ;;  %v65_v6 = vrot.slane %v64_v62, 2  ;;  %v112_v41 = vld [vmem:[%s514_s2 + $0x70] sm:$0xff]  ;;  %v113_v42 = vld [vmem:[%s514_s2 + $0x78] sm:$0xff]  ;;  %s215_s20 = sshll.u32 %s316_s19, 4  ;;  %s216_s20 = int_to_ptr.vmem [resolvable:$true] %s215_s20 }
  0x12   :  { %276 = vmatprep.subr.bf16.mxu0 %v275_v34  ;;  %v36_v7 = vadd.f32 %v35_v63, %v34_v55  ;;  %v42_v8 = vadd.f32 %v41_v0, %v40_v56  ;;  %v48_v9 = vadd.f32 %v47_v1, %v46_v57  ;;  %v71_v10 = vrot.slane %v70_v2, 2  ;;  %v223_v49 = vld [vmem:[%s515_s3] ss:$0 sm:$0xff]  ;;  %s292_s21 = scalar_lea.vmem %s216_s20, 128  ;;  %p297_p1 = scmp.lt.s32.totalorder %s216_s20, %s216_s20 }
  0x13   :  { %v31_v11 = vrot.slane %v30_v3, 1  ;;  %v54_v12 = vadd.f32 %v53_v4, %v52_v60  ;;  %v60_v13 = vadd.f32 %v59_v5, %v58_v61  ;;  %v66_v14 = vadd.f32 %v65_v6, %v64_v62  ;;  %p293_p0 = scmp.ne.s32.totalorder %s216_s20, %s292_s21  ;;  %p298_p2 = scmp.lt.s32.totalorder %s292_s21, %s292_s21 }
  0x14   :  { %v37_v15 = vrot.slane %v36_v7, 1  ;;  %v43_v16 = vrot.slane %v42_v8, 1  ;;  %v49_v17 = vrot.slane %v48_v9, 1  ;;  %v72_v18 = vadd.f32 %v71_v10, %v70_v2 }
  0x15   :  { %278 = vmatpush3.bf16.msra.mxu0 %v277_v36  ;;  %v32_v21 = vadd.f32 %v31_v11, %v30_v3  ;;  %v55_v22 = vrot.slane %v54_v12, 1  ;;  %v61_v23 = vrot.slane %v60_v13, 1  ;;  %v67_v24 = vrot.slane %v66_v14, 1  ;;  %p299_p3 = por %p298_p2, %p297_p1 }
  0x16   :  { %280 = vmatprep.subr.bf16.mxu0 %v279_v37  ;;  %v38_v27 = vadd.f32 %v37_v15, %v36_v7  ;;  %v44_v30 = vadd.f32 %v43_v16, %v42_v8  ;;  %v50_v33 = vadd.f32 %v49_v17, %v48_v9  ;;  %v73_v34 = vrot.slane %v72_v18, 1 }
  0x17   :  { %v56_v35 = vadd.f32 %v55_v22, %v54_v12  ;;  %vm87_vm2 = vcmask 1043459   ;;  %v285_v36 = vpack.c.bf16 %v111_v20, %v110_v19  ;;  %v62_v37 = vadd.f32 %v61_v23, %v60_v13  ;;  %p300_p4 = pnand %p299_p3, %p293_p0 }
  0x18   :  { %v84_v39 = vsel %vm83_vm0, %v38_v27, %v32_v21  ;;  %vm89_vm3 = vcmask 1044484   ;;  %v287_v40 = vpack.c.bf16 %v129_v26, %v128_v25  ;;  %v68_v28 = vadd.f32 %v67_v24, %v66_v14 }
  0x19   :  { %282 = vmatpush3.bf16.msra.mxu0 %v281_v38  ;;  %v86_v29 = vsel %vm85_vm1, %v44_v30, %v84_v39  ;;  %vm91_vm4 = vcmask 1045509   ;;  %v74_v38 = vadd.f32 %v73_v34, %v72_v18  ;;  %vm93_vm5 = vcmask 1046534  }
  0x1a   :  { %284 = vmatprep.subr.bf16.mxu0 %v283_v43  ;;  %v88_v44 = vsel %vm87_vm2, %v50_v33, %v86_v29  ;;  %vm95_vm6 = vcmask 1047559   ;;  %v289_v31 = vpack.c.bf16 %v113_v42, %v112_v41 }
  0x1b   :  { %v90_v45 = vsel %vm89_vm3, %v56_v35, %v88_v44 }
  0x1c   :  { %v92_v32 = vsel %vm91_vm4, %v62_v37, %v90_v45 }
  0x1d   :  { %286 = vmatpush3.bf16.msra.mxu0 %v285_v36  ;;  %v94_v43 = vsel %vm93_vm5, %v68_v28, %v92_v32 }
  0x1e   :  { %288 = vmatprep.subr.bf16.mxu0 %v287_v40  ;;  %v96_v46 = vsel %vm95_vm6, %v74_v38, %v94_v43 }
  0x1f   :  { %201 = vmatprep.mubr.f32.mxu0 %v96_v46 }
  0x21   :  { %290 = vmatpush3.bf16.msra.mxu0 %v289_v31 }
  0x24   :  { %202 = vmatmul.mubr.f32.vlgmr.msra.gmra.mrb[0].mxu0 %v18_v47 }
  0xf7   :  { %v256_v48 = vpop.f32.mrb[0].mxu0 }
  0xf8   :  { %v257_v50 = vpop.f32.mrb[1].mxu0 }
  0xf9   :  { %v258_v51 = vadd.f32 %v257_v50, %v256_v48 }
  0xfb   :  { %v204_v52 = vadd.f32 %v258_v51, %v223_v49 }
  0xfd   :  { %v207_v53 = vmax.f32 %v204_v52, 0.0 }
  0xff   :  { %208 = vst [vmem:[#allocation2] sm:$0xff] %v207_v53 }
 0x100   :  { %303 = shalt.err (!%p300_p4)
}
 0x101   :  { %s304_s23 = scalar_lea.hbm %s516_s4, 128 }
 0x102   :  { %p305_p5 = scmp.ne.s32.totalorder %s516_s4, %s304_s23  ;;  %p308_p6 = scmp.lt.u32.totalorder %s304_s23, %s516_s4 }
 0x104   :  { %p310_p7 = pnand %p308_p6, %p305_p5 }
 0x106   :  { %313 = shalt.err (!%p310_p7)
}
 0x107   :  { %218 = dma.vmem_to_hbm [thread:$0]  %s216_s20, 128, %s516_s4, [#allocation3]  }
 0x108   :  { %314 = dma.done.wait [#allocation3], 128  }
 0x109   :  { %315 = vsyncadd [#allocation3], 4294967168 }
 0x10a   :  { %222 = vsyncpa [#allocation3], 1 }

// kernel: closed_call.4
= control target key start
LH: loop header
LB: loop body
LE: loop exit
PB: predicated region body
PF: predicated region fallthrough
CT: control target
= control target key end

     0   :  { %12 = vsyncpa [#allocation3], 0  ;;  %s1180_s24 = smov [#allocation2]   ;;  %s1616_s0 = inlined_call_operand.vmem [shape: f32[8,128], index: 0, kind: input, shape index: {}]   ;;  %s1617_s1 = inlined_call_operand.vmem [shape: f32[8,8,128], index: 1, kind: input, shape index: {}]   ;;  %s1618_s2 = inlined_call_operand.hbm [shape: f32[128,384], index: 2, kind: input, shape index: {}]   ;;  %s1619_s3 = inlined_call_operand.vmem [shape: f32[128,128], index: 3, kind: input, shape index: {}]   ;;  %s1620_s4 = inlined_call_operand.vmem [shape: f32[1,128], index: 4, kind: input, shape index: {}]   ;;  %s1621_s5 = inlined_call_operand.vmem [shape: f32[256,256], index: 5, kind: input, shape index: {}]   ;;  %s1622_s6 = inlined_call_operand.vmem [shape: f32[1,256], index: 6, kind: input, shape index: {}]   ;;  %s1623_s7 = inlined_call_operand.vmem [shape: f32[8,128], index: 7, kind: output, shape index: {}]  }
   0x1   :  { %s22_s25 = sshll.u32 %s1180_s24, 4  ;;  %s1156_s28 = scalar_lea.hbm %s1618_s2, 6144  ;;  %s23_s25 = int_to_ptr.vmem [resolvable:$true] %s22_s25 }
   0x2   :  { %p1157_p0 = scmp.ne.s32.totalorder %s1618_s2, %s1156_s28  ;;  %p1160_p1 = scmp.lt.u32.totalorder %s1156_s28, %s1618_s2 }
   0x4   :  { %p1162_p2 = pnand %p1160_p1, %p1157_p0 }
   0x6   :  { %1165 = shalt.err (!%p1162_p2)
}
   0x7   :  { %s1166_s10 = scalar_lea.vmem %s23_s25, 6144  ;;  %p1171_p4 = scmp.lt.s32.totalorder %s23_s25, %s23_s25 }
   0x8   :  { %p1167_p3 = scmp.ne.s32.totalorder %s23_s25, %s1166_s10  ;;  %p1172_p5 = scmp.lt.s32.totalorder %s1166_s10, %s1166_s10 }
   0xa   :  { %p1173_p6 = por %p1172_p5, %p1171_p4 }
   0xc   :  { %p1174_p7 = pnand %p1173_p6, %p1167_p3 }
   0xe   :  { %1177 = shalt.err (!%p1174_p7)
}
   0xf   :  { %s1181_s11 = smov 384   ;;  %s1182_s12 = smov 24  }
  0x10   :  { %28 = dma.hbm_to_vmem [thread:$0]  %s1618_s2, 6144, %s23_s25, [#allocation3], %s1181_s11, %s1181_s11, %s1182_s12  }
  0x11   :  { %1178 = dma.done.wait [#allocation3], 6144  }
  0x12   :  { %1179 = vsyncadd [#allocation3], 4294961152  ;;  %v1183_v0 = vmov 0.0   ;;  %v1184_v1 = vmov 0.0|0.0   ;;  %v50_v2 = vld [vmem:[#allocation2 + $0x8] sm:$0xff]  ;;  %v53_v3 = vld [vmem:[#allocation2 + $0x20] sm:$0xff] }
  0x13   :  { %161 = vmatprep.mubr.f32.mxu0 %v1183_v0  ;;  %991 = vmatprep.subr.bf16.mxu1 %v1184_v1  ;;  %v49_v4 = vld [vmem:[#allocation2] sm:$0xff]  ;;  %v959_v5 = vpack.c.bf16 %v53_v3, %v50_v2  ;;  %v52_v6 = vld [vmem:[#allocation2 + $0x18] sm:$0xff]  ;;  %v59_v8 = vld [vmem:[#allocation2 + $0x50] sm:$0xff]  ;;  %vm1185_vm0 = vmmov 0   ;;  %vm632_vm1 = vcmask 1041409   ;;  %vm634_vm2 = vcmask 1042434  }
  0x14   :  { %v56_v7 = vld [vmem:[#allocation2 + $0x38] sm:$0xff]  ;;  %v961_v9 = vpack.c.bf16 %v52_v6, %v49_v4  ;;  %v55_v11 = vld [vmem:[#allocation2 + $0x30] sm:$0xff]  ;;  %v58_v12 = vld [vmem:[#allocation2 + $0x48] sm:$0xff]  ;;  %912 = vmatprep.mubr.msk.f32.mxu1 %vm1185_vm0, %v1183_v0  ;;  %vm636_vm3 = vcmask 1043459   ;;  %vm638_vm4 = vcmask 1044484   ;;  %vm640_vm5 = vcmask 1045509  }
  0x15   :  { %v963_v10 = vpack.c.bf16 %v59_v8, %v56_v7  ;;  %v62_v13 = vld [vmem:[#allocation2 + $0x68] sm:$0xff]  ;;  %960 = vmatprep.subr.bf16.mxu0 %v959_v5  ;;  %v65_v14 = vld [vmem:[#allocation2 + $0x80] sm:$0xff]  ;;  %v965_v15 = vpack.c.bf16 %v58_v12, %v55_v11  ;;  %v64_v18 = vld [vmem:[#allocation2 + $0x78] sm:$0xff]  ;;  %vm642_vm6 = vcmask 1046534   ;;  %vm644_vm7 = vcmask 1047559  }
  0x16   :  { %962 = vmatpush1.bf16.msra.mxu0 %v961_v9  ;;  %v967_v16 = vpack.c.bf16 %v65_v14, %v62_v13  ;;  %v61_v17 = vld [vmem:[#allocation2 + $0x60] sm:$0xff]  ;;  %v68_v19 = vld [vmem:[#allocation2 + $0x98] sm:$0xff]  ;;  %v71_v20 = vld [vmem:[#allocation2 + $0xb0] sm:$0xff] }
  0x17   :  { %964 = vmatprep.subr.bf16.mxu0 %v963_v10  ;;  %v969_v21 = vpack.c.bf16 %v64_v18, %v61_v17  ;;  %v971_v22 = vpack.c.bf16 %v71_v20, %v68_v19  ;;  %v67_v23 = vld [vmem:[#allocation2 + $0x90] sm:$0xff]  ;;  %v70_v24 = vld [vmem:[#allocation2 + $0xa8] sm:$0xff]  ;;  %v77_v26 = vld [vmem:[#allocation2 + $0xe0] sm:$0xff] }
  0x18   :  { %v74_v25 = vld [vmem:[#allocation2 + $0xc8] sm:$0xff]  ;;  %v973_v27 = vpack.c.bf16 %v70_v24, %v67_v23  ;;  %v73_v29 = vld [vmem:[#allocation2 + $0xc0] sm:$0xff]  ;;  %v76_v30 = vld [vmem:[#allocation2 + $0xd8] sm:$0xff] }
  0x19   :  { %v975_v28 = vpack.c.bf16 %v77_v26, %v74_v25  ;;  %v80_v31 = vld [vmem:[#allocation2 + $0xf8] sm:$0xff]  ;;  %v83_v32 = vld [vmem:[#allocation2 + $0x110] sm:$0xff]  ;;  %v977_v33 = vpack.c.bf16 %v76_v30, %v73_v29  ;;  %v82_v36 = vld [vmem:[#allocation2 + $0x108] sm:$0xff] }
  0x1a   :  { %966 = vmatpush1.bf16.msra.mxu0 %v965_v15  ;;  %v979_v34 = vpack.c.bf16 %v83_v32, %v80_v31  ;;  %v79_v35 = vld [vmem:[#allocation2 + $0xf0] sm:$0xff]  ;;  %v86_v37 = vld [vmem:[#allocation2 + $0x128] sm:$0xff]  ;;  %v89_v38 = vld [vmem:[#allocation2 + $0x140] sm:$0xff] }
  0x1b   :  { %968 = vmatprep.subr.bf16.mxu0 %v967_v16  ;;  %v981_v39 = vpack.c.bf16 %v82_v36, %v79_v35  ;;  %v983_v40 = vpack.c.bf16 %v89_v38, %v86_v37  ;;  %v85_v41 = vld [vmem:[#allocation2 + $0x120] sm:$0xff]  ;;  %v88_v42 = vld [vmem:[#allocation2 + $0x138] sm:$0xff]  ;;  %v95_v44 = vld [vmem:[#allocation2 + $0x170] sm:$0xff] }
  0x1c   :  { %v92_v43 = vld [vmem:[#allocation2 + $0x158] sm:$0xff]  ;;  %v985_v45 = vpack.c.bf16 %v88_v42, %v85_v41  ;;  %v91_v46 = vld [vmem:[#allocation2 + $0x150] sm:$0xff]  ;;  %v94_v48 = vld [vmem:[#allocation2 + $0x168] sm:$0xff] }
  0x1d   :  { %v987_v47 = vpack.c.bf16 %v95_v44, %v92_v43  ;;  %v51_v49 = vld [vmem:[#allocation2 + $0x10] sm:$0xff]  ;;  %v54_v50 = vld [vmem:[#allocation2 + $0x28] sm:$0xff]  ;;  %v238_v51 = vld [vmem:[%s1619_s3] sm:$0xff]  ;;  %v989_v53 = vpack.c.bf16 %v94_v48, %v91_v46 }
  0x1e   :  { %970 = vmatpush1.bf16.msra.mxu0 %v969_v21  ;;  %v239_v52 = vld [vmem:[%s1619_s3 + $0x8] sm:$0xff]  ;;  %v992_v54 = vpack.c.bf16 %v54_v50, %v51_v49  ;;  %v240_v56 = vld [vmem:[%s1619_s3 + $0x10] sm:$0xff]  ;;  %v241_v57 = vld [vmem:[%s1619_s3 + $0x18] sm:$0xff] }
  0x1f   :  { %972 = vmatprep.subr.bf16.mxu0 %v971_v22  ;;  %v1015_v55 = vpack.c.bf16 %v239_v52, %v238_v51  ;;  %v1257_v58 = vld [vmem:[%s1616_s0] sm:$0xff]  ;;  %v1019_v59 = vpack.c.bf16 %v241_v57, %v240_v56  ;;  %v243_v62 = vld [vmem:[%s1619_s3 + $0x28] sm:$0xff]  ;;  %v244_v2 = vld [vmem:[%s1619_s3 + $0x30] sm:$0xff] }
  0x20   :  { %993 = vmatpush3.bf16.msra.mxu1 %v992_v54  ;;  %v1262_v60 = vld [vmem:[%s1617_s1] sm:$0xff]  ;;  %v245_v3 = vld [vmem:[%s1619_s3 + $0x38] sm:$0xff]  ;;  %v247_v6 = vld [vmem:[%s1619_s3 + $0x48] sm:$0xff] }
  0x21   :  { %994 = vmatprep.subr.bf16.mxu1 %v1184_v1  ;;  %v242_v61 = vld [vmem:[%s1619_s3 + $0x20] sm:$0xff]  ;;  %v1027_v4 = vpack.c.bf16 %v245_v3, %v244_v2  ;;  %v248_v8 = vld [vmem:[%s1619_s3 + $0x50] sm:$0xff]  ;;  %v249_v9 = vld [vmem:[%s1619_s3 + $0x58] sm:$0xff] }
  0x22   :  { %974 = vmatpush1.bf16.msra.mxu0 %v973_v27  ;;  %v1023_v63 = vpack.c.bf16 %v243_v62, %v242_v61  ;;  %v246_v5 = vld [vmem:[%s1619_s3 + $0x40] sm:$0xff]  ;;  %v1035_v10 = vpack.c.bf16 %v249_v9, %v248_v8  ;;  %v251_v12 = vld [vmem:[%s1619_s3 + $0x68] sm:$0xff]  ;;  %v252_v14 = vld [vmem:[%s1619_s3 + $0x70] sm:$0xff] }
  0x23   :  { %976 = vmatprep.subr.bf16.mxu0 %v975_v28  ;;  %v1031_v7 = vpack.c.bf16 %v247_v6, %v246_v5  ;;  %v250_v11 = vld [vmem:[%s1619_s3 + $0x60] sm:$0xff]  ;;  %v253_v15 = vld [vmem:[%s1619_s3 + $0x78] sm:$0xff]  ;;  %v1305_v17 = vld [vmem:[%s1617_s1 + $0x8] sm:$0xff] }
  0x24   :  { %v1039_v13 = vpack.c.bf16 %v251_v12, %v250_v11  ;;  %v1043_v16 = vpack.c.bf16 %v253_v15, %v252_v14  ;;  %v1310_v18 = vld [vmem:[%s1617_s1 + $0x10] sm:$0xff]  ;;  %v1317_v19 = vld [vmem:[%s1617_s1 + $0x18] sm:$0xff]  ;;  %v1322_v20 = vld [vmem:[%s1617_s1 + $0x20] sm:$0xff] }
  0x25   :  { %v1329_v21 = vld [vmem:[%s1617_s1 + $0x28] sm:$0xff]  ;;  %v1334_v22 = vld [vmem:[%s1617_s1 + $0x30] sm:$0xff]  ;;  %v1341_v23 = vld [vmem:[%s1617_s1 + $0x38] sm:$0xff] }
  0x26   :  { %978 = vmatpush1.bf16.msra.mxu0 %v977_v33  ;;  %v57_v24 = vld [vmem:[#allocation2 + $0x40] sm:$0xff]  ;;  %v60_v25 = vld [vmem:[#allocation2 + $0x58] sm:$0xff]  ;;  %v63_v27 = vld [vmem:[#allocation2 + $0x70] sm:$0xff] }
  0x27   :  { %980 = vmatprep.subr.bf16.mxu0 %v979_v34  ;;  %v995_v26 = vpack.c.bf16 %v60_v25, %v57_v24  ;;  %v66_v28 = vld [vmem:[#allocation2 + $0x88] sm:$0xff]  ;;  %v69_v30 = vld [vmem:[#allocation2 + $0xa0] sm:$0xff]  ;;  %v72_v31 = vld [vmem:[#allocation2 + $0xb8] sm:$0xff] }
  0x28   :  { %v998_v29 = vpack.c.bf16 %v66_v28, %v63_v27  ;;  %v1001_v32 = vpack.c.bf16 %v72_v31, %v69_v30  ;;  %v75_v33 = vld [vmem:[#allocation2 + $0xd0] sm:$0xff]  ;;  %v78_v34 = vld [vmem:[#allocation2 + $0xe8] sm:$0xff]  ;;  %v81_v36 = vld [vmem:[#allocation2 + $0x100] sm:$0xff] }
  0x29   :  { %996 = vmatpush3.bf16.msra.mxu1 %v995_v26  ;;  %v1004_v35 = vpack.c.bf16 %v78_v34, %v75_v33  ;;  %v84_v37 = vld [vmem:[#allocation2 + $0x118] sm:$0xff]  ;;  %v93_v42 = vld [vmem:[#allocation2 + $0x160] sm:$0xff]  ;;  %v664_v0 = vld [vmem:[%s1621_s5 + $0x8] sm:$0xff] }
  0x2a   :  { %982 = vmatpush1.bf16.msra.mxu0 %v981_v39  ;;  %997 = vmatprep.subr.bf16.mxu1 %v1184_v1  ;;  %v1007_v38 = vpack.c.bf16 %v84_v37, %v81_v36  ;;  %v87_v39 = vld [vmem:[#allocation2 + $0x130] sm:$0xff]  ;;  %v96_v43 = vld [vmem:[#allocation2 + $0x178] sm:$0xff]  ;;  %v668_v50 = vld [vmem:[%s1621_s5 + $0x28] sm:$0xff] }
  0x2b   :  { %984 = vmatprep.subr.bf16.mxu0 %v983_v40  ;;  %v90_v40 = vld [vmem:[#allocation2 + $0x148] sm:$0xff]  ;;  %v666_v44 = vld [vmem:[%s1621_s5 + $0x18] sm:$0xff]  ;;  %v665_v48 = vld [vmem:[%s1621_s5 + $0x10] sm:$0xff] }
  0x2c   :  { %v1010_v41 = vpack.c.bf16 %v90_v40, %v87_v39  ;;  %v1047_v46 = vpack.c.bf16 %v666_v44, %v664_v0  ;;  %v667_v52 = vld [vmem:[%s1621_s5 + $0x20] sm:$0xff]  ;;  %v674_v56 = vld [vmem:[%s1621_s5 + $0x58] sm:$0xff]  ;;  %v676_v62 = vld [vmem:[%s1621_s5 + $0x68] sm:$0xff] }
  0x2d   :  { %999 = vmatpush3.bf16.msra.mxu1 %v998_v29  ;;  %v675_v3 = vld [vmem:[%s1621_s5 + $0x60] sm:$0xff]  ;;  %v680_v6 = vld [vmem:[%s1621_s5 + $0x88] sm:$0xff]  ;;  %v690_v26 = vld [vmem:[%s1621_s5 + $0xd8] sm:$0xff] }
  0x2e   :  { %986 = vmatpush1.bf16.msra.mxu0 %v985_v45  ;;  %1000 = vmatprep.subr.bf16.mxu1 %v1184_v1  ;;  %v1013_v45 = vpack.c.bf16 %v96_v43, %v93_v42  ;;  %v679_v9 = vld [vmem:[%s1621_s5 + $0x80] sm:$0xff]  ;;  %v684_v12 = vld [vmem:[%s1621_s5 + $0xa8] sm:$0xff]  ;;  %v689_v29 = vld [vmem:[%s1621_s5 + $0xd0] sm:$0xff] }
  0x2f   :  { %988 = vmatprep.subr.bf16.mxu0 %v987_v47  ;;  %v663_v47 = vld [vmem:[%s1621_s5] sm:$0xff]  ;;  %v688_v25 = vld [vmem:[%s1621_s5 + $0xc8] sm:$0xff]  ;;  %v702_v0 = vld [vmem:[%s1621_s5 + $0x138] sm:$0xff] }
  0x30   :  { %v1049_v49 = vpack.c.bf16 %v665_v48, %v663_v47  ;;  %v683_v15 = vld [vmem:[%s1621_s5 + $0xa0] sm:$0xff]  ;;  %v1071_v27 = vpack.c.bf16 %v690_v26, %v688_v25  ;;  %v692_v31 = vld [vmem:[%s1621_s5 + $0xe8] sm:$0xff] }
  0x31   :  { %1002 = vmatpush3.bf16.msra.mxu1 %v1001_v32  ;;  %v687_v28 = vld [vmem:[%s1621_s5 + $0xc0] sm:$0xff]  ;;  %v694_v32 = vld [vmem:[%s1621_s5 + $0xf8] sm:$0xff]  ;;  %v696_v37 = vld [vmem:[%s1621_s5 + $0x108] sm:$0xff] }
  0x32   :  { %990 = vmatpush1.bf16.msra.mxu0 %v989_v53  ;;  %1003 = vmatprep.subr.bf16.mxu1 %v1184_v1  ;;  %v669_v53 = vld [vmem:[%s1621_s5 + $0x30] sm:$0xff]  ;;  %v1073_v30 = vpack.c.bf16 %v689_v29, %v687_v28  ;;  %v1075_v33 = vpack.c.bf16 %v694_v32, %v692_v31  ;;  %v691_v34 = vld [vmem:[%s1621_s5 + $0xe0] sm:$0xff]  ;;  %v700_v43 = vld [vmem:[%s1621_s5 + $0x128] sm:$0xff]  ;;  %v1186_v31 = vmov 1966171168  }
  0x33   :  { %1016 = vmatprep.subr.bf16.mxu0 %v1015_v55  ;;  %v1053_v54 = vpack.c.bf16 %v669_v53, %v667_v52  ;;  %v695_v40 = vld [vmem:[%s1621_s5 + $0x100] sm:$0xff]  ;;  %v1083_v44 = vpack.c.bf16 %v702_v0, %v700_v43  ;;  %v704_v48 = vld [vmem:[%s1621_s5 + $0x148] sm:$0xff]  ;;  %v362_v32 = vunpack.c.l.s4 %v1186_v31 }
  0x34   :  { %v708_v53 = vld [vmem:[%s1621_s5 + $0x168] sm:$0xff]  ;;  %v723_v26 = vld [vmem:[%s1621_s5 + $0x1e0] sm:$0xff] }
  0x35   :  { %162 = vmatmul.mubr.f32.vlgmr.msra.gmra.mrb[0].mxu0 %v1257_v58  ;;  %1005 = vmatpush3.bf16.msra.mxu1 %v1004_v35  ;;  %v693_v35 = vld [vmem:[%s1621_s5 + $0xf0] sm:$0xff] }
  0x36   :  { %1018 = vmatpush3.bf16.msra.mxu0 %v1015_v55  ;;  %947 = vmatprep.mubr.f32.mxu0 %v1262_v60  ;;  %v672_v55 = vld [vmem:[%s1621_s5 + $0x48] sm:$0xff]  ;;  %v1077_v36 = vpack.c.bf16 %v693_v35, %v691_v34  ;;  %v363_v34 = vunpack.c.0.s8 %v362_v32 }
  0x37   :  { %1020 = vmatprep.subr.bf16.mxu0 %v1019_v59  ;;  %1006 = vmatprep.subr.bf16.mxu1 %v1184_v1  ;;  %v1055_v57 = vpack.c.bf16 %v674_v56, %v672_v55  ;;  %v707_v55 = vld [vmem:[%s1621_s5 + $0x160] sm:$0xff] }
  0x39   :  { %1008 = vmatpush3.bf16.msra.mxu1 %v1007_v38  ;;  %v698_v38 = vld [vmem:[%s1621_s5 + $0x118] sm:$0xff] }
  0x3a   :  { %1022 = vmatpush3.bf16.msra.mxu0 %v1019_v59  ;;  %1009 = vmatprep.subr.bf16.mxu1 %v1184_v1  ;;  %v673_v59 = vld [vmem:[%s1621_s5 + $0x50] sm:$0xff]  ;;  %v1079_v39 = vpack.c.bf16 %v698_v38, %v696_v37 }
  0x3b   :  { %1024 = vmatprep.subr.bf16.mxu0 %v1023_v63 }
  0x3d   :  { %1011 = vmatpush3.bf16.msra.mxu1 %v1010_v41  ;;  %v697_v41 = vld [vmem:[%s1621_s5 + $0x110] sm:$0xff] }
  0x3e   :  { %1026 = vmatpush3.bf16.msra.mxu0 %v1023_v63  ;;  %1012 = vmatprep.subr.bf16.mxu1 %v1184_v1  ;;  %v670_v1 = vld [vmem:[%s1621_s5 + $0x38] sm:$0xff]  ;;  %v1081_v42 = vpack.c.bf16 %v697_v41, %v695_v40 }
  0x3f   :  { %1028 = vmatprep.subr.bf16.mxu0 %v1027_v4  ;;  %v1051_v51 = vpack.c.bf16 %v670_v1, %v668_v50  ;;  %v678_v63 = vld [vmem:[%s1621_s5 + $0x78] sm:$0xff]  ;;  %v703_v1 = vld [vmem:[%s1621_s5 + $0x140] sm:$0xff] }
  0x40   :  { %v1059_v2 = vpack.c.bf16 %v678_v63, %v676_v62  ;;  %v711_v63 = vld [vmem:[%s1621_s5 + $0x180] sm:$0xff] }
  0x41   :  { %1014 = vmatpush3.bf16.msra.mxu1 %v1013_v45  ;;  %v699_v45 = vld [vmem:[%s1621_s5 + $0x120] sm:$0xff] }
  0x42   :  { %1030 = vmatpush3.bf16.msra.mxu0 %v1027_v4  ;;  %1048 = vmatprep.subr.bf16.mxu1 %v1047_v46  ;;  %v677_v4 = vld [vmem:[%s1621_s5 + $0x70] sm:$0xff] }
  0x43   :  { %1032 = vmatprep.subr.bf16.mxu0 %v1031_v7  ;;  %v1061_v5 = vpack.c.bf16 %v677_v4, %v675_v3  ;;  %v701_v46 = vld [vmem:[%s1621_s5 + $0x130] sm:$0xff]  ;;  %v716_v3 = vld [vmem:[%s1621_s5 + $0x1a8] sm:$0xff]  ;;  %v718_v4 = vld [vmem:[%s1621_s5 + $0x1b8] sm:$0xff] }
  0x44   :  { %913 = vmatmul.mubr.f32.vlgmr.msra.gmra.mrb[0].mxu1 %v1257_v58  ;;  %v671_v58 = vld [vmem:[%s1621_s5 + $0x40] sm:$0xff]  ;;  %v1085_v47 = vpack.c.bf16 %v701_v46, %v699_v45 }
  0x45   :  { %1050 = vmatpush1.bf16.msra.mxu1 %v1049_v49  ;;  %v1057_v61 = vpack.c.bf16 %v673_v59, %v671_v58  ;;  %v706_v49 = vld [vmem:[%s1621_s5 + $0x158] sm:$0xff]  ;;  %v712_v58 = vld [vmem:[%s1621_s5 + $0x188] sm:$0xff] }
  0x46   :  { %1034 = vmatpush3.bf16.msra.mxu0 %v1031_v7  ;;  %1052 = vmatprep.subr.bf16.mxu1 %v1051_v51  ;;  %v682_v7 = vld [vmem:[%s1621_s5 + $0x98] sm:$0xff]  ;;  %v1087_v50 = vpack.c.bf16 %v706_v49, %v704_v48  ;;  %v705_v51 = vld [vmem:[%s1621_s5 + $0x150] sm:$0xff] }
  0x47   :  { %1036 = vmatprep.subr.bf16.mxu0 %v1035_v10  ;;  %v1063_v8 = vpack.c.bf16 %v682_v7, %v680_v6  ;;  %v1089_v52 = vpack.c.bf16 %v705_v51, %v703_v1  ;;  %v714_v59 = vld [vmem:[%s1621_s5 + $0x198] sm:$0xff]  ;;  %v1099_v6 = vpack.c.bf16 %v718_v4, %v716_v3  ;;  %v715_v7 = vld [vmem:[%s1621_s5 + $0x1a0] sm:$0xff] }
  0x48   :  { %v1095_v62 = vpack.c.bf16 %v714_v59, %v712_v58 }
  0x49   :  { %1054 = vmatpush1.bf16.msra.mxu1 %v1053_v54  ;;  %v710_v54 = vld [vmem:[%s1621_s5 + $0x178] sm:$0xff] }
  0x4a   :  { %1038 = vmatpush3.bf16.msra.mxu0 %v1035_v10  ;;  %1056 = vmatprep.subr.bf16.mxu1 %v1055_v57  ;;  %v681_v10 = vld [vmem:[%s1621_s5 + $0x90] sm:$0xff]  ;;  %v1091_v56 = vpack.c.bf16 %v710_v54, %v708_v53 }
  0x4b   :  { %1040 = vmatprep.subr.bf16.mxu0 %v1039_v13  ;;  %v1065_v11 = vpack.c.bf16 %v681_v10, %v679_v9  ;;  %v709_v57 = vld [vmem:[%s1621_s5 + $0x170] sm:$0xff]  ;;  %v720_v9 = vld [vmem:[%s1621_s5 + $0x1c8] sm:$0xff]  ;;  %v722_v10 = vld [vmem:[%s1621_s5 + $0x1d8] sm:$0xff] }
  0x4d   :  { %1058 = vmatpush1.bf16.msra.mxu1 %v1057_v61  ;;  %v1093_v61 = vpack.c.bf16 %v709_v57, %v707_v55 }
  0x4e   :  { %1042 = vmatpush3.bf16.msra.mxu0 %v1039_v13  ;;  %1060 = vmatprep.subr.bf16.mxu1 %v1059_v2  ;;  %v686_v13 = vld [vmem:[%s1621_s5 + $0xb8] sm:$0xff]  ;;  %v713_v2 = vld [vmem:[%s1621_s5 + $0x190] sm:$0xff] }
  0x4f   :  { %1044 = vmatprep.subr.bf16.mxu0 %v1043_v16  ;;  %v1067_v14 = vpack.c.bf16 %v686_v13, %v684_v12  ;;  %v1103_v12 = vpack.c.bf16 %v722_v10, %v720_v9  ;;  %v719_v13 = vld [vmem:[%s1621_s5 + $0x1c0] sm:$0xff] }
  0x51   :  { %1062 = vmatpush1.bf16.msra.mxu1 %v1061_v5  ;;  %v1097_v5 = vpack.c.bf16 %v713_v2, %v711_v63 }
  0x52   :  { %1046 = vmatpush3.bf16.msra.mxu0 %v1043_v16  ;;  %1064 = vmatprep.subr.bf16.mxu1 %v1063_v8  ;;  %v685_v16 = vld [vmem:[%s1621_s5 + $0xb0] sm:$0xff] }
  0x53   :  { %v1069_v24 = vpack.c.bf16 %v685_v16, %v683_v15  ;;  %v717_v8 = vld [vmem:[%s1621_s5 + $0x1b0] sm:$0xff]  ;;  %v724_v15 = vld [vmem:[%s1621_s5 + $0x1e8] sm:$0xff]  ;;  %v726_v16 = vld [vmem:[%s1621_s5 + $0x1f8] sm:$0xff] }
  0x54   :  { %v1107_v25 = vpack.c.bf16 %v726_v16, %v724_v15 }
  0x55   :  { %948 = vmatmul.mubr.f32.vlgmr.msra.gmra.mrb[2].mxu0 %v1305_v17  ;;  %1066 = vmatpush1.bf16.msra.mxu1 %v1065_v11  ;;  %v1101_v11 = vpack.c.bf16 %v717_v8, %v715_v7 }
  0x56   :  { %950 = vmatprep.mubr.f32.mxu0 %v1310_v18  ;;  %1068 = vmatprep.subr.bf16.mxu1 %v1067_v14  ;;  %v721_v14 = vld [vmem:[%s1621_s5 + $0x1d0] sm:$0xff] }
  0x59   :  { %951 = vmatmul.mubr.f32.gmra.mrb[4].mxu0 %v1317_v19  ;;  %1070 = vmatpush1.bf16.msra.mxu1 %v1069_v24  ;;  %v1105_v24 = vpack.c.bf16 %v721_v14, %v719_v13 }
  0x5a   :  { %953 = vmatprep.mubr.f32.mxu0 %v1322_v20  ;;  %1072 = vmatprep.subr.bf16.mxu1 %v1071_v27  ;;  %v725_v27 = vld [vmem:[%s1621_s5 + $0x1f0] sm:$0xff] }
  0x5b   :  { %v1109_v28 = vpack.c.bf16 %v725_v27, %v723_v26 }
  0x5d   :  { %954 = vmatmul.mubr.f32.gmra.mrb[6].mxu0 %v1329_v21  ;;  %1074 = vmatpush1.bf16.msra.mxu1 %v1073_v30 }
  0x5e   :  { %956 = vmatprep.mubr.f32.mxu0 %v1334_v22  ;;  %1076 = vmatprep.subr.bf16.mxu1 %v1075_v33  ;;  %v364_v33 = vlaneseq }
  0x60   :  { %v1546_v35 = vshrl.u32 %v364_v33, 7 }
  0x61   :  { %957 = vmatmul.mubr.f32.gmra.mrb[8].mxu0 %v1341_v23  ;;  %1078 = vmatpush1.bf16.msra.mxu1 %v1077_v36 }
  0x62   :  { %1080 = vmatprep.subr.bf16.mxu1 %v1079_v39  ;;  %v366_v36 = vsub.s32 %v363_v34, %v1546_v35  ;;  %v1550_v43 = vsub.s32 0, %v1546_v35 }
  0x65   :  { %1082 = vmatpush1.bf16.msra.mxu1 %v1081_v42 }
  0x66   :  { %1084 = vmatprep.subr.bf16.mxu1 %v1083_v44 }
  0x69   :  { %1086 = vmatpush1.bf16.msra.mxu1 %v1085_v47  ;;  %v829_v47 = vld [vmem:[%s1620_s4] ss:$0 sm:$0xff] }
  0x6a   :  { %1088 = vmatprep.subr.bf16.mxu1 %v1087_v50 }
  0x6d   :  { %1090 = vmatpush1.bf16.msra.mxu1 %v1089_v52 }
  0x6e   :  { %1092 = vmatprep.subr.bf16.mxu1 %v1091_v56 }
  0x71   :  { %1094 = vmatpush1.bf16.msra.mxu1 %v1093_v61 }
  0x72   :  { %1096 = vmatprep.subr.bf16.mxu1 %v1095_v62 }
  0x75   :  { %1098 = vmatpush1.bf16.msra.mxu1 %v1097_v5 }
  0x76   :  { %1100 = vmatprep.subr.bf16.mxu1 %v1099_v6 }
  0x79   :  { %1102 = vmatpush1.bf16.msra.mxu1 %v1101_v11 }
  0x7a   :  { %1104 = vmatprep.subr.bf16.mxu1 %v1103_v12 }
  0x7d   :  { %1106 = vmatpush1.bf16.msra.mxu1 %v1105_v24 }
  0x7e   :  { %1108 = vmatprep.subr.bf16.mxu1 %v1107_v25 }
  0x81   :  { %1110 = vmatpush1.bf16.msra.mxu1 %v1109_v28 }
 0x108   :  { %v1544_v29 = vpop.f32.mrb[0].mxu0 }
 0x109   :  { %v165_v30 = vpop.f32.mrb[1].mxu0 }
 0x10a   :  { %v367_v37 = vrot.slane %v165_v30, %v366_v36  ;;  %v360_v38 = vcombine.high %v165_v30, %v165_v30 }
 0x10c   :  { %v375_v39 = vcombine.high %v367_v37, %v367_v37  ;;  %v374_v40 = vrot.slane %v360_v38, %v366_v36  ;;  %v383_v42 = vrot.slane %v367_v37, %v366_v36  ;;  %v520_v37 = vrot.slane %v1262_v60, 4 }
 0x10d   :  { %v526_v38 = vrot.slane %v1305_v17, 4 }
 0x10e   :  { %v397_v41 = vrot.slane %v375_v39, %v366_v36  ;;  %v376_v0 = vcombine.high %v374_v40, %v374_v40  ;;  %v412_v48 = vrot.slane %v383_v42, %v1550_v43  ;;  %v405_v49 = vcombine.high %v383_v42, %v383_v42 }
 0x10f   :  { %v390_v58 = vrot.slane %v374_v40, %v366_v36 }
 0x110   :  { %v416_v44 = vrot.slane %v397_v41, %v1550_v43  ;;  %v407_v45 = vcombine.high %v397_v41, %v397_v41  ;;  %v404_v54 = vrot.slane %v376_v0, %v366_v36  ;;  %v420_v57 = vrot.slane %v405_v49, %v1550_v43 }
 0x111   :  { %v428_v8 = vrot.slane %v390_v58, %v1550_v43  ;;  %v406_v9 = vcombine.high %v390_v58, %v390_v58  ;;  %v532_v0 = vrot.slane %v1310_v18, 4  ;;  %v527_v49 = vadd.f32 %v526_v38, %v1305_v17 }
 0x112   :  { %v424_v53 = vrot.slane %v407_v45, %v1550_v43  ;;  %v432_v4 = vrot.slane %v404_v54, %v1550_v43  ;;  %v408_v5 = vcombine.high %v404_v54, %v404_v54  ;;  %v538_v45 = vrot.slane %v1317_v19, 4 }
 0x113   :  { %v436_v26 = vrot.slane %v406_v9, %v1550_v43 }
 0x114   :  { %v440_v16 = vrot.slane %v408_v5, %v1550_v43 }
 0x128   :  { %v949_v46 = vpop.f32.mrb[2].mxu0 }
 0x129   :  { %v450_v50 = vadd.f32 %v949_v46, %v416_v44  ;;  %v320_v1 = vpop.f32.mrb[3].mxu0  ;;  %v544_v46 = vrot.slane %v1322_v20, 4 }
 0x12a   :  { %v449_v51 = vadd.f32 %v412_v48, %v320_v1  ;;  %v550_v1 = vrot.slane %v1329_v21, 4 }
 0x12b   :  { %v465_v52 = vadd.f32 %v829_v47, %v450_v50 }
 0x12c   :  { %v464_v55 = vadd.f32 %v829_v47, %v449_v51  ;;  %v952_v56 = vpop.f32.mrb[4].mxu0  ;;  %v556_v51 = vrot.slane %v1334_v22, 4 }
 0x12d   :  { %v831_v59 = vmul.f32 -1.442695, %v465_v52  ;;  %v452_v61 = vadd.f32 %v952_v56, %v424_v53  ;;  %v330_v62 = vpop.f32.mrb[5].mxu0  ;;  %v533_v53 = vadd.f32 %v532_v0, %v1310_v18  ;;  %v545_v56 = vadd.f32 %v544_v46, %v1322_v20 }
 0x12e   :  { %v830_v63 = vmul.f32 -1.442695, %v464_v55  ;;  %v451_v2 = vadd.f32 %v420_v57, %v330_v62  ;;  %v539_v55 = vadd.f32 %v538_v45, %v1317_v19  ;;  %v528_v62 = vrot.slane %v527_v49, 2 }
 0x12f   :  { %1118 = vpow2.f32 %v831_v59  ;;  %v467_v3 = vadd.f32 %v829_v47, %v452_v61  ;;  %v562_v59 = vrot.slane %v1341_v23, 4 }
 0x130   :  { %1120 = vpow2.f32 %v830_v63  ;;  %v466_v6 = vadd.f32 %v829_v47, %v451_v2  ;;  %v955_v7 = vpop.f32.mrb[6].mxu0  ;;  %v551_v63 = vadd.f32 %v550_v1, %v1329_v21  ;;  %v557_v2 = vadd.f32 %v556_v51, %v1334_v22 }
 0x131   :  { %v833_v10 = vmul.f32 -1.442695, %v467_v3  ;;  %v454_v11 = vadd.f32 %v955_v7, %v432_v4  ;;  %v340_v12 = vpop.f32.mrb[7].mxu0  ;;  %v534_v4 = vrot.slane %v533_v53, 2  ;;  %v546_v7 = vrot.slane %v545_v56, 2 }
 0x132   :  { %v832_v13 = vmul.f32 -1.442695, %v466_v6  ;;  %v453_v14 = vadd.f32 %v428_v8, %v340_v12  ;;  %v540_v6 = vrot.slane %v539_v55, 2  ;;  %v529_v12 = vadd.f32 %v528_v62, %v527_v49 }
 0x133   :  { %1122 = vpow2.f32 %v833_v10  ;;  %v469_v15 = vadd.f32 %v829_v47, %v454_v11  ;;  %v563_v10 = vadd.f32 %v562_v59, %v1341_v23 }
 0x134   :  { %1124 = vpow2.f32 %v832_v13  ;;  %v468_v24 = vadd.f32 %v829_v47, %v453_v14  ;;  %v958_v25 = vpop.f32.mrb[8].mxu0  ;;  %v552_v13 = vrot.slane %v551_v63, 2  ;;  %v558_v14 = vrot.slane %v557_v2, 2 }
 0x135   :  { %v835_v27 = vmul.f32 -1.442695, %v469_v15  ;;  %v456_v28 = vadd.f32 %v958_v25, %v440_v16  ;;  %v350_v30 = vpop.f32.mrb[9].mxu0 }
 0x136   :  { %v834_v31 = vmul.f32 -1.442695, %v468_v24  ;;  %v455_v32 = vadd.f32 %v436_v26, %v350_v30  ;;  %v535_v24 = vadd.f32 %v534_v4, %v533_v53  ;;  %v1583_v38 = vadd.f32 %v552_v13, %v551_v63 }
 0x137   :  { %1126 = vpow2.f32 %v835_v27  ;;  %v471_v33 = vadd.f32 %v829_v47, %v456_v28  ;;  %v541_v27 = vadd.f32 %v540_v6, %v539_v55  ;;  %v1580_v28 = vadd.f32 %v546_v7, %v545_v56 }
 0x138   :  { %1128 = vpow2.f32 %v834_v31  ;;  %v470_v34 = vadd.f32 %v829_v47, %v455_v32  ;;  %v521_v47 = vadd.f32 %v520_v37, %v1262_v60  ;;  %v564_v32 = vrot.slane %v563_v10, 2 }
 0x139   :  { %v1119_v36 = vpop.eup %1118  ;;  %v837_v39 = vmul.f32 -1.442695, %v471_v33  ;;  %v530_v37 = vrot.slane %v529_v12, 1 }
 0x13a   :  { %v1121_v40 = vpop.eup %1120  ;;  %v497_v41 = vadd.f32 1.0, %v1119_v36  ;;  %v836_v42 = vmul.f32 -1.442695, %v470_v34  ;;  %v522_v58 = vrot.slane %v521_v47, 2 }
 0x13b   :  { %v496_v44 = vadd.f32 1.0, %v1121_v40  ;;  %1130 = vpow2.f32 %v837_v39  ;;  %v1585_v39 = vadd.f32 %v558_v14, %v557_v2  ;;  %v531_v51 = vadd.f32 %v530_v37, %v529_v12 }
 0x13c   :  { %1132 = vrcp.f32 %v497_v41  ;;  %v523_v9 = vadd.f32 %v522_v58, %v521_v47  ;;  %v536_v41 = vrot.slane %v535_v24, 1  ;;  %v1590_v47 = vadd.f32 %v564_v32, %v563_v10 }
 0x13d   :  { %v1123_v48 = vpop.eup %1122  ;;  %1134 = vrcp.f32 %v496_v44  ;;  %v548_v44 = vrot.slane %v1580_v28, 1 }
 0x13e   :  { %v1125_v50 = vpop.eup %1124  ;;  %v499_v52 = vadd.f32 1.0, %v1123_v48  ;;  %1136 = vpow2.f32 %v836_v42  ;;  %v524_v31 = vrot.slane %v523_v9, 1  ;;  %v537_v59 = vadd.f32 %v536_v41, %v535_v24 }
 0x13f   :  { %v498_v54 = vadd.f32 1.0, %v1125_v50 }
 0x140   :  { %1138 = vrcp.f32 %v499_v52  ;;  %v525_v48 = vadd.f32 %v524_v31, %v523_v9  ;;  %v554_v52 = vrot.slane %v1583_v38, 1 }
 0x141   :  { %v1127_v57 = vpop.eup %1126  ;;  %1140 = vrcp.f32 %v498_v54 }
 0x142   :  { %v1129_v61 = vpop.eup %1128  ;;  %v501_v3 = vadd.f32 1.0, %v1127_v57  ;;  %v633_v6 = vsel %vm632_vm1, %v531_v51, %v525_v48  ;;  %v555_v41 = vadd.f32 %v554_v52, %v1583_v38 }
 0x143   :  { %v500_v5 = vadd.f32 1.0, %v1129_v61 }
 0x144   :  { %1142 = vrcp.f32 %v501_v3 }
 0x145   :  { %v1131_v8 = vpop.eup %1130  ;;  %1144 = vrcp.f32 %v500_v5 }
 0x146   :  { %v1133_v11 = vpop.eup %1132  ;;  %v503_v15 = vadd.f32 1.0, %v1131_v8 }
 0x147   :  { %v1135_v16 = vpop.eup %1134  ;;  %v569_v25 = vmul.f32 %v1133_v11, %v1305_v17 }
 0x148   :  { %v1137_v26 = vpop.eup %1136  ;;  %v568_v30 = vmul.f32 %v1135_v16, %v1262_v60  ;;  %1146 = vrcp.f32 %v503_v15  ;;  %v542_v60 = vrot.slane %v541_v27, 1 }
 0x149   :  { %v582_v33 = vrot.slane %v569_v25, 4  ;;  %v502_v34 = vadd.f32 1.0, %v1137_v26  ;;  %v635_v26 = vsel %vm634_vm2, %v537_v59, %v633_v6 }
 0x14a   :  { %v1139_v36 = vpop.eup %1138  ;;  %v576_v40 = vrot.slane %v568_v30, 4  ;;  %v543_v63 = vadd.f32 %v542_v60, %v541_v27 }
 0x14b   :  { %v1141_v17 = vpop.eup %1140  ;;  %v583_v42 = vadd.f32 %v582_v33, %v569_v25  ;;  %v571_v0 = vmul.f32 %v1139_v36, %v1317_v19  ;;  %1148 = vrcp.f32 %v502_v34  ;;  %v560_v19 = vrot.slane %v1585_v39, 1 }
 0x14c   :  { %v577_v45 = vadd.f32 %v576_v40, %v568_v30  ;;  %v570_v46 = vmul.f32 %v1141_v17, %v1310_v18  ;;  %v637_v17 = vsel %vm636_vm3, %v543_v63, %v635_v26 }
 0x14d   :  { %v584_v49 = vrot.slane %v583_v42, 2  ;;  %v594_v50 = vrot.slane %v571_v0, 4 }
 0x14e   :  { %v1143_v1 = vpop.eup %1142  ;;  %v578_v53 = vrot.slane %v577_v45, 2  ;;  %v588_v54 = vrot.slane %v570_v46, 4 }
 0x14f   :  { %v1145_v55 = vpop.eup %1144  ;;  %v573_v56 = vmul.f32 %v1143_v1, %v1329_v21  ;;  %v585_v57 = vadd.f32 %v584_v49, %v583_v42  ;;  %v595_v58 = vadd.f32 %v594_v50, %v571_v0  ;;  %v566_v1 = vrot.slane %v1590_v47, 1 }
 0x150   :  { %v589_v18 = vadd.f32 %v588_v54, %v570_v46  ;;  %v572_v61 = vmul.f32 %v1145_v55, %v1322_v20  ;;  %v579_v62 = vadd.f32 %v578_v53, %v577_v45  ;;  %v561_v53 = vadd.f32 %v560_v19, %v1585_v39  ;;  %v727_v19 = vld [vmem:[%s1622_s6] sm:$0x3] }
 0x151   :  { %v586_v2 = vrot.slane %v585_v57, 1  ;;  %v596_v3 = vrot.slane %v595_v58, 2  ;;  %v606_v4 = vrot.slane %v573_v56, 4 }
 0x152   :  { %v1147_v5 = vpop.eup %1146  ;;  %v580_v7 = vrot.slane %v579_v62, 1  ;;  %v590_v8 = vrot.slane %v589_v18, 2  ;;  %v600_v9 = vrot.slane %v572_v61, 4 }
 0x153   :  { %v575_v10 = vmul.f32 %v1147_v5, %v1341_v23  ;;  %v587_v21 = vadd.f32 %v586_v2, %v585_v57  ;;  %v597_v11 = vadd.f32 %v596_v3, %v595_v58  ;;  %v607_v12 = vadd.f32 %v606_v4, %v573_v56  ;;  %v234_v3 = vpop.f32.mrb[0].mxu1 }
 0x154   :  { %v581_v13 = vadd.f32 %v580_v7, %v579_v62  ;;  %v591_v14 = vadd.f32 %v590_v8, %v589_v18  ;;  %v601_v15 = vadd.f32 %v600_v9, %v572_v61  ;;  %v549_v23 = vadd.f32 %v548_v44, %v1580_v28  ;;  %v914_v39 = vpop.f32.mrb[1].mxu1 }
 0x155   :  { %v1149_v20 = vpop.eup %1148  ;;  %v598_v16 = vrot.slane %v597_v11, 1  ;;  %v608_v24 = vrot.slane %v607_v12, 2  ;;  %v618_v25 = vrot.slane %v575_v10, 4  ;;  %v567_v58 = vadd.f32 %v566_v1, %v1590_v47 }
 0x156   :  { %v574_v27 = vmul.f32 %v1149_v20, %v1334_v22  ;;  %v592_v30 = vrot.slane %v591_v14, 1  ;;  %v602_v31 = vrot.slane %v601_v15, 2  ;;  %v655_v32 = vsel %vm632_vm1, %v587_v21, %v581_v13 }
 0x157   :  { %v609_v33 = vadd.f32 %v608_v24, %v607_v12  ;;  %v619_v34 = vadd.f32 %v618_v25, %v575_v10  ;;  %v599_v42 = vadd.f32 %v598_v16, %v597_v11  ;;  %v639_v28 = vsel %vm638_vm4, %v549_v23, %v637_v17 }
 0x158   :  { %v593_v36 = vadd.f32 %v592_v30, %v591_v14  ;;  %v603_v37 = vadd.f32 %v602_v31, %v601_v15  ;;  %v612_v40 = vrot.slane %v574_v27, 4  ;;  %v641_v54 = vsel %vm640_vm5, %v555_v41, %v639_v28 }
 0x159   :  { %v610_v0 = vrot.slane %v609_v33, 1  ;;  %v620_v60 = vrot.slane %v619_v34, 2  ;;  %v643_v59 = vsel %vm642_vm6, %v561_v53, %v641_v54  ;;  %v735_v4 = vsub.s32 1, %v1546_v35 }
 0x15a   :  { %v604_v45 = vrot.slane %v603_v37, 1  ;;  %v613_v22 = vadd.f32 %v612_v40, %v574_v27  ;;  %v656_v46 = vsel %vm634_vm2, %v593_v36, %v655_v32  ;;  %v645_v63 = vsel %vm644_vm7, %v567_v58, %v643_v59 }
 0x15b   :  { %v621_v48 = vadd.f32 %v620_v60, %v619_v34  ;;  %v657_v49 = vsel %vm636_vm3, %v599_v42, %v656_v46  ;;  %v611_v51 = vadd.f32 %v610_v0, %v609_v33  ;;  %v732_v5 = vrot.slane %v727_v19, %v1550_v43 }
 0x15c   :  { %v605_v44 = vadd.f32 %v604_v45, %v603_v37  ;;  %v614_v50 = vrot.slane %v613_v22, 2  ;;  %v736_v47 = vrot.slane %v727_v19, %v735_v4 }
 0x15d   :  { %v622_v55 = vrot.slane %v621_v48, 1 }
 0x15e   :  { %v615_v38 = vadd.f32 %v614_v50, %v613_v22  ;;  %v658_v52 = vsel %vm638_vm4, %v605_v44, %v657_v49 }
 0x15f   :  { %v659_v56 = vsel %vm640_vm5, %v611_v51, %v658_v52  ;;  %v623_v61 = vadd.f32 %v622_v55, %v621_v48 }
 0x160   :  { %v616_v57 = vrot.slane %v615_v38, 1 }
 0x162   :  { %v617_v18 = vadd.f32 %v616_v57, %v615_v38 }
 0x164   :  { %v660_v62 = vsel %vm642_vm6, %v617_v18, %v659_v56 }
 0x165   :  { %v661_v2 = vsel %vm644_vm7, %v623_v61, %v660_v62 }
 0x166   :  { %803 = vmatprep.mubr.f32.mxu1 %v661_v2 }
 0x167   :  { %804 = vmatmul.mubr.f32.vlgmr.msra.gmra.mrb[2].mxu1 %v645_v63 }
 0x23a   :  { %v805_v6 = vpop.f32.mrb[2].mxu1 }
 0x23b   :  { %v806_v7 = vadd.f32 %v805_v6, %v732_v5  ;;  %v807_v8 = vpop.f32.mrb[3].mxu1 }
 0x23c   :  { %v808_v9 = vadd.f32 %v807_v8, %v736_v47 }
 0x23d   :  { %v810_v10 = vadd.f32 %v806_v7, %v1544_v29 }
 0x23e   :  { %v817_v21 = vadd.f32 %v808_v9, %v234_v3 }
 0x23f   :  { %v838_v11 = vmul.f32 -1.442695, %v810_v10 }
 0x241   :  { %1150 = vpow2.f32 %v838_v11 }
 0x242   :  { %1152 = vtanh.f32 %v817_v21 }
 0x24b   :  { %v1151_v12 = vpop.eup %1150 }
 0x24c   :  { %v814_v13 = vadd.f32 1.0, %v1151_v12  ;;  %v1153_v14 = vpop.eup %1152 }
 0x24e   :  { %1154 = vrcp.f32 %v814_v13 }
 0x258   :  { %v1155_v15 = vpop.eup %1154 }
 0x259   :  { %v819_v20 = vsub.f32 1.0, %v1155_v15  ;;  %v821_v35 = vmul.f32 %v1155_v15, %v1153_v14 }
 0x25b   :  { %v820_v16 = vmul.f32 %v819_v20, %v645_v63 }
 0x25d   :  { %v822_v43 = vadd.f32 %v821_v35, %v820_v16 }
 0x25f   :  { %823 = vst [vmem:[%s1623_s7] sm:$0xff] %v822_v43 }
 0x260   :  { %828 = vsyncpa [#allocation3], 1 }

</bundles_post_ra>
